<compile_context>
chip_gen: v7x
topology: tpu7x:2x2x1
jax: 0.10.0
libtpu: 0.0.40
codegen_flags: <defaults>
</compile_context>

<pallas_src>
import functools

import jax
import jax.numpy as jnp
from jax.experimental import pallas as pl
from jax.experimental.pallas import tpu as pltpu


def _round_up(x, m):
    return (x + m - 1) // m * m


def _softplus_f32(x):
    # PyTorch F.softplus(beta=1, threshold=20): x if x > 20 else log1p(exp(x)).
    return jnp.where(x > 20.0, x, jnp.log1p(jnp.exp(jnp.minimum(x, 20.0))))


def _num_tensorcores():
    """Best-effort TensorCore count of the local device (2 on v7x, else 1)."""
    try:
        d = jax.local_devices()[0]
        n = getattr(d, "num_cores", None)
        if n:
            return int(n)
        if "v7" in str(getattr(d, "device_kind", "")).lower():
            return 2
    except Exception:
        pass
    return 1


def _vmem_capacity_bytes():
    try:
        return int(pltpu.get_tpu_info().vmem_capacity_bytes)
    except Exception:
        return 128 << 20  # v5e/v6e physical VMEM


def _phi_w_kernel(x_ref, w1_ref, b1_ref, w2_ref, b2_ref, w3_ref, b3_ref,
                  out_ref, *, add_skip):
    """One batch tile: dense1 -> softplus -> dense2 -> softplus -> dense3 (+ skip)."""
    h_pad = out_ref.shape[-1]
    cdt = w2_ref.dtype  # MXU input dtype (bf16 by default); f32 accumulation below.

    x = x_ref[...]                                              # (TB, D_pad)
    # Fused first linear (+ skip matmul when add_skip): one MXU pass over x.
    h_all = jnp.dot(x, w1_ref[...],
                    preferred_element_type=jnp.float32) + b1_ref[...]
    if add_skip:
        h = h_all[:, :h_pad]
        skip = h_all[:, h_pad:]
    else:
        h = h_all

    # Softplus in f32 for accuracy; dot inputs cast back to the compute dtype.
    h = _softplus_f32(h)
    h = jnp.dot(h.astype(cdt), w2_ref[...],
                preferred_element_type=jnp.float32) + b2_ref[...]
    h = _softplus_f32(h)
    h = jnp.dot(h.astype(cdt), w3_ref[...],
                preferred_element_type=jnp.float32) + b3_ref[...]

    if add_skip:
        h = h + skip
    out_ref[...] = h.astype(out_ref.dtype)


def prepack_phi_w_params(params, *, add_skip, compute_dtype=jnp.bfloat16):
    """One-time repack of PyTorch-layout weights into the kernel layout.

    Call this ONCE and reuse the result across forward calls.  It transposes
    weights to (in, out), zero-pads feature dims to multiples of 128
    (lane-dense MXU columns / unmasked stores), fuses the skip weight into a
    [w1 | wskip] (D_pad, 2*H_pad) block, and casts matmul inputs to bf16.
    Zero-padding is a correctness invariant: padded hidden columns produce
    softplus(0)=0.693 garbage that is annihilated by the zero-padded rows of
    w2/w3.
    """
    f32 = jnp.float32
    H, D = params["w1"].shape
    D_pad = _round_up(D, 128)
    H_pad = _round_up(H, 128)

    def pad2(a, r, c):
        return jnp.pad(a.astype(f32), ((0, r - a.shape[0]), (0, c - a.shape[1])))

    def pad1(a, n):
        return jnp.pad(a.astype(f32), ((0, n - a.shape[0]),))

    # Pre-transpose to (in, out) so the kernel hot path is plain `h @ W + b`.
    w1 = pad2(params["w1"].T, D_pad, H_pad)
    b1 = pad1(params["b1"], H_pad)
    if add_skip:
        wskip = pad2(params["wskip"].T, D_pad, H_pad)
        w1 = jnp.concatenate([w1, wskip], axis=1)               # (D_pad, 2*H_pad)
        b1 = jnp.concatenate([b1, jnp.zeros((H_pad,), f32)])    # skip has no bias
    w2 = pad2(params["w2"].T, H_pad, H_pad)
    b2 = pad1(params["b2"], H_pad)
    w3 = pad2(params["w3"].T, H_pad, H_pad)
    b3 = pad1(params["b3"], H_pad)
    w1c = w1.shape[1]

    packed = {
        "w1": w1.astype(compute_dtype), "b1": b1.reshape(1, w1c),
        "w2": w2.astype(compute_dtype), "b2": b2.reshape(1, H_pad),
        "w3": w3.astype(compute_dtype), "b3": b3.reshape(1, H_pad),
    }
    meta = dict(D=D, H=H, D_pad=D_pad, H_pad=H_pad, w1c=w1c,
                add_skip=add_skip, compute_dtype=jnp.dtype(compute_dtype))
    return packed, meta


def phi_w_forward(x, packed, meta, *, batch_tile=None, out_dtype=None):
    """Forward pass using pre-packed weights from prepack_phi_w_params.

    x: (B, D) float32.  Per-call wrapper work is only the x pad/cast; all
    weight repacking is done once at prepack time.
    """
    B, D = x.shape
    assert D == meta["D"], "input dim mismatch with packed params"
    add_skip = meta["add_skip"]
    D_pad, H_pad, w1c = meta["D_pad"], meta["H_pad"], meta["w1c"]
    compute_dtype = meta["compute_dtype"]
    out_dtype = x.dtype if out_dtype is None else out_dtype

    itemsize = jnp.dtype(compute_dtype).itemsize
    out_itemsize = jnp.dtype(out_dtype).itemsize
    sub = 8 * (4 // itemsize)            # sublane rows: 8 (f32) / 16 (bf16)
    b_al = _round_up(B, sub)

    # Batch-tile heuristic (TC-aware):
    #   * 1 TensorCore (v5e/v6e): grid is a serial loop -> one step up to 1024
    #     rows, then tile at 1024 to amortize the ~0.35us/step overhead.
    #   * 2 TensorCores (v7x): split only when each core gets >= 256 rows;
    #     tile at 512 for big batches so >= 2 "parallel" steps remain.
    if batch_tile is not None:
        tb = min(_round_up(batch_tile, sub), b_al)
    else:
        n_tc = _num_tensorcores()
        if n_tc >= 2 and b_al >= 512:
            tb = 512 if b_al >= 1024 else _round_up(pl.cdiv(b_al, n_tc), sub)
        else:
            tb = min(1024, b_al)
    B_pad = _round_up(b_al, tb)

    # NOTE: this pad+cast is one extra XLA op over x; for very large HBM-bound
    # batches fuse it into the upstream producer of x instead.
    xp = jnp.pad(x.astype(jnp.float32),
                 ((0, B_pad - B), (0, D_pad - D))).astype(compute_dtype)

    w1, b1 = packed["w1"], packed["b1"]
    w2, b2 = packed["w2"], packed["b2"]
    w3, b3 = packed["w3"], packed["b3"]

    # VMEM budget: weights (single-buffered below), double-buffered IO tiles,
    # in-flight activations, margin; capped at ~60% of device VMEM.
    w_bytes = ((w1.size + w2.size + w3.size) * itemsize
               + (b1.size + b2.size + b3.size) * 4)
    io_bytes = tb * D_pad * itemsize + tb * H_pad * out_itemsize
    act_bytes = 6 * tb * max(w1c, H_pad) * 4
    vmem_cap = max(16 << 20, int(0.6 * _vmem_capacity_bytes()))

    flops = 2 * B_pad * (D_pad * w1c + 2 * H_pad * H_pad)
    cost = pl.CostEstimate(
        flops=int(flops),
        transcendentals=int(4 * B_pad * H_pad),   # 2 softplus: exp + log1p each
        bytes_accessed=int(xp.size * itemsize + w_bytes
                           + B_pad * H_pad * out_itemsize))

    kernel = functools.partial(_phi_w_kernel, add_skip=add_skip)

    def build_call(weight_mode, w_mult):
        wkw = {} if weight_mode is None else {"pipeline_mode": weight_mode}
        vmem_limit = int(min(max(w_mult * w_bytes + 2 * io_bytes + act_bytes
                                 + (8 << 20), 16 << 20), vmem_cap))
        return pl.pallas_call(
            kernel,
            out_shape=jax.ShapeDtypeStruct((B_pad, H_pad), out_dtype),
            grid_spec=pltpu.PrefetchScalarGridSpec(
                num_scalar_prefetch=0,
                grid=(B_pad // tb,),
                in_specs=[
                    pl.BlockSpec((tb, D_pad), lambda i: (i, 0)),            # x tile
                    pl.BlockSpec((D_pad, w1c), lambda i: (0, 0), **wkw),    # [w1|wskip]
                    pl.BlockSpec((1, w1c), lambda i: (0, 0), **wkw),        # b1
                    pl.BlockSpec((H_pad, H_pad), lambda i: (0, 0), **wkw),  # w2
                    pl.BlockSpec((1, H_pad), lambda i: (0, 0), **wkw),      # b2
                    pl.BlockSpec((H_pad, H_pad), lambda i: (0, 0), **wkw),  # w3
                    pl.BlockSpec((1, H_pad), lambda i: (0, 0), **wkw),      # b3
                ],
                out_specs=pl.BlockSpec((tb, H_pad), lambda i: (i, 0)),
            ),
            compiler_params=pltpu.CompilerParams(
                dimension_semantics=("parallel",),
                vmem_limit_bytes=vmem_limit),
            cost_estimate=cost,
        )

    args = (xp, w1, b1, w2, b2, w3, b3)
    try:
        # Grid-invariant weights are fetched once -> single-buffer them
        # (VMEM hygiene, most relevant on v7x's 64 MiB).
        out_padded = build_call(pl.Buffered(1), 1)(*args)
    except Exception:
        # Fallback: default double-buffering (budget recomputed with 2x weights).
        out_padded = build_call(None, 2)(*args)

    return out_padded[:B, :meta["H"]]


def init_phi_w_params(key, input_dim, hidden_dim, *, add_skip):
    """Deterministic synthetic init in PyTorch nn.Linear layout (out, in)."""
    ks = jax.random.split(key, 7)
    s = 0.1
    p = {
        "w1": s * jax.random.normal(ks[0], (hidden_dim, input_dim), jnp.float32),
        "b1": s * jax.random.normal(ks[1], (hidden_dim,), jnp.float32),
        "w2": s * jax.random.normal(ks[2], (hidden_dim, hidden_dim), jnp.float32),
        "b2": s * jax.random.normal(ks[3], (hidden_dim,), jnp.float32),
        "w3": s * jax.random.normal(ks[4], (hidden_dim, hidden_dim), jnp.float32),
        "b3": s * jax.random.normal(ks[5], (hidden_dim,), jnp.float32),
    }
    if add_skip:
        p["wskip"] = s * jax.random.normal(ks[6], (hidden_dim, input_dim),
                                           jnp.float32)
    return p


def phi_w_reference(x, params, *, add_skip):
    """Pure-JAX reference (f32) for sanity checking."""
    h = x @ params["w1"].T + params["b1"]
    h = _softplus_f32(h)
    h = h @ params["w2"].T + params["b2"]
    h = _softplus_f32(h)
    h = h @ params["w3"].T + params["b3"]
    if add_skip:
        h = h + x @ params["wskip"].T
    return h


if __name__ == "__main__":
    key = jax.random.PRNGKey(0)
    B, D, H = 64, 16, 32   # small shapes: batch=64, input_dim=16, hidden_dim=32

    kx, kp = jax.random.split(key)
    x = jax.random.normal(kx, (B, D), jnp.float32)

    # --- add_skip=True path (skip matmul fused into the first linear) ---
    params = init_phi_w_params(kp, D, H, add_skip=True)
    with jax.default_matmul_precision("highest"):
        ref = phi_w_reference(x, params, add_skip=True)

    packed_f32, meta_f32 = prepack_phi_w_params(params, add_skip=True,
                                                compute_dtype=jnp.float32)
    out_f32 = jax.block_until_ready(phi_w_forward(x, packed_f32, meta_f32))
    assert out_f32.shape == (B, H)
    assert jnp.allclose(out_f32, ref, atol=2e-3, rtol=2e-3), "f32 kernel mismatch"

    packed_bf16, meta_bf16 = prepack_phi_w_params(params, add_skip=True)
    out_bf16 = jax.block_until_ready(phi_w_forward(x, packed_bf16, meta_bf16))
    assert out_bf16.shape == (B, H)
    assert jnp.allclose(out_bf16, ref, atol=5e-2, rtol=5e-2), "bf16 kernel mismatch"

    # --- add_skip=False path ---
    params_ns = init_phi_w_params(kp, D, H, add_skip=False)
    with jax.default_matmul_precision("highest"):
        ref_ns = phi_w_reference(x, params_ns, add_skip=False)
    packed_ns, meta_ns = prepack_phi_w_params(params_ns, add_skip=False)
    out_ns = jax.block_until_ready(phi_w_forward(x, packed_ns, meta_ns))
    assert jnp.allclose(out_ns, ref_ns, atol=5e-2, rtol=5e-2), "no-skip kernel mismatch"

    print("KERNEL_OK")
</pallas_src>

<mosaic_0001>
module attributes {stable_mosaic.version = 11 : i64} {
  func.func @_phi_w_kernel(%arg0: i32, %arg1: memref<64x128xf32, #tpu.memory_space<vmem>>, %arg2: memref<128x256xf32, #tpu.memory_space<vmem>>, %arg3: memref<1x256xf32, #tpu.memory_space<vmem>>, %arg4: memref<128x128xf32, #tpu.memory_space<vmem>>, %arg5: memref<1x128xf32, #tpu.memory_space<vmem>>, %arg6: memref<128x128xf32, #tpu.memory_space<vmem>>, %arg7: memref<1x128xf32, #tpu.memory_space<vmem>>, %arg8: memref<64x128xf32, #tpu.memory_space<vmem>>) attributes {dimension_semantics = [#tpu.dimension_semantics<parallel>], iteration_bounds = array<i64: 1>, scalar_prefetch = 0 : i64, scratch_operands = 0 : i64, tpu.core_type = #tpu.core_type<tc>, window_params = [{transform_indices = @transform_0, window_bounds = array<i64: 64, 128>}, {pipeline_mode = #tpu.pipeline_mode<synchronous>, transform_indices = @transform_1, window_bounds = array<i64: 128, 256>}, {pipeline_mode = #tpu.pipeline_mode<synchronous>, transform_indices = @transform_2, window_bounds = array<i64: 1, 256>}, {pipeline_mode = #tpu.pipeline_mode<synchronous>, transform_indices = @transform_3, window_bounds = array<i64: 128, 128>}, {pipeline_mode = #tpu.pipeline_mode<synchronous>, transform_indices = @transform_4, window_bounds = array<i64: 1, 128>}, {pipeline_mode = #tpu.pipeline_mode<synchronous>, transform_indices = @transform_5, window_bounds = array<i64: 128, 128>}, {pipeline_mode = #tpu.pipeline_mode<synchronous>, transform_indices = @transform_6, window_bounds = array<i64: 1, 128>}, {transform_indices = @transform_7, window_bounds = array<i64: 64, 128>}]} {
    %c0 = arith.constant 0 : index
    %c0_0 = arith.constant 0 : index
    %0 = vector.load %arg1[%c0, %c0_0] : memref<64x128xf32, #tpu.memory_space<vmem>>, vector<64x128xf32>
    %c0_1 = arith.constant 0 : index
    %c0_2 = arith.constant 0 : index
    %1 = vector.load %arg2[%c0_1, %c0_2] : memref<128x256xf32, #tpu.memory_space<vmem>>, vector<128x256xf32>
    %cst = arith.constant dense<0.000000e+00> : vector<64x256xf32>
    %2 = tpu.matmul %0, %1, %cst {dimension_numbers = #tpu.dot_dimension_numbers<[1], [0], [0], [1], [0, 0, 1, 1], [], []>} : vector<64x128xf32>, vector<128x256xf32>, vector<64x256xf32> -> vector<64x256xf32>
    %c0_3 = arith.constant 0 : index
    %c0_4 = arith.constant 0 : index
    %3 = vector.load %arg3[%c0_3, %c0_4] : memref<1x256xf32, #tpu.memory_space<vmem>>, vector<1x256xf32>
    %4 = vector.broadcast %3 : vector<1x256xf32> to vector<64x256xf32>
    %5 = arith.addf %2, %4 : vector<64x256xf32>
    %6 = vector.extract_strided_slice %5 {offsets = [0, 0], sizes = [64, 128], strides = [1, 1]} : vector<64x256xf32> to vector<64x128xf32>
    %7 = vector.extract_strided_slice %5 {offsets = [0, 128], sizes = [64, 128], strides = [1, 1]} : vector<64x256xf32> to vector<64x128xf32>
    %cst_5 = arith.constant 2.000000e+01 : f32
    %8 = vector.broadcast %cst_5 : f32 to vector<64x128xf32>
    %9 = arith.cmpf ogt, %6, %8 : vector<64x128xf32>
    %cst_6 = arith.constant 2.000000e+01 : f32
    %10 = vector.broadcast %cst_6 : f32 to vector<64x128xf32>
    %11 = arith.minimumf %6, %10 : vector<64x128xf32>
    %12 = math.exp %11 : vector<64x128xf32>
    %13 = math.log1p %12 : vector<64x128xf32>
    %14 = arith.select %9, %6, %13 : vector<64x128xi1>, vector<64x128xf32>
    %c0_7 = arith.constant 0 : index
    %c0_8 = arith.constant 0 : index
    %15 = vector.load %arg4[%c0_7, %c0_8] : memref<128x128xf32, #tpu.memory_space<vmem>>, vector<128x128xf32>
    %cst_9 = arith.constant dense<0.000000e+00> : vector<64x128xf32>
    %16 = tpu.matmul %14, %15, %cst_9 {dimension_numbers = #tpu.dot_dimension_numbers<[1], [0], [0], [1], [0, 0, 1, 1], [], []>} : vector<64x128xf32>, vector<128x128xf32>, vector<64x128xf32> -> vector<64x128xf32>
    %c0_10 = arith.constant 0 : index
    %c0_11 = arith.constant 0 : index
    %17 = vector.load %arg5[%c0_10, %c0_11] : memref<1x128xf32, #tpu.memory_space<vmem>>, vector<1x128xf32>
    %18 = vector.broadcast %17 : vector<1x128xf32> to vector<64x128xf32>
    %19 = arith.addf %16, %18 : vector<64x128xf32>
    %cst_12 = arith.constant 2.000000e+01 : f32
    %20 = vector.broadcast %cst_12 : f32 to vector<64x128xf32>
    %21 = arith.cmpf ogt, %19, %20 : vector<64x128xf32>
    %cst_13 = arith.constant 2.000000e+01 : f32
    %22 = vector.broadcast %cst_13 : f32 to vector<64x128xf32>
    %23 = arith.minimumf %19, %22 : vector<64x128xf32>
    %24 = math.exp %23 : vector<64x128xf32>
    %25 = math.log1p %24 : vector<64x128xf32>
    %26 = arith.select %21, %19, %25 : vector<64x128xi1>, vector<64x128xf32>
    %c0_14 = arith.constant 0 : index
    %c0_15 = arith.constant 0 : index
    %27 = vector.load %arg6[%c0_14, %c0_15] : memref<128x128xf32, #tpu.memory_space<vmem>>, vector<128x128xf32>
    %cst_16 = arith.constant dense<0.000000e+00> : vector<64x128xf32>
    %28 = tpu.matmul %26, %27, %cst_16 {dimension_numbers = #tpu.dot_dimension_numbers<[1], [0], [0], [1], [0, 0, 1, 1], [], []>} : vector<64x128xf32>, vector<128x128xf32>, vector<64x128xf32> -> vector<64x128xf32>
    %c0_17 = arith.constant 0 : index
    %c0_18 = arith.constant 0 : index
    %29 = vector.load %arg7[%c0_17, %c0_18] : memref<1x128xf32, #tpu.memory_space<vmem>>, vector<1x128xf32>
    %30 = vector.broadcast %29 : vector<1x128xf32> to vector<64x128xf32>
    %31 = arith.addf %28, %30 : vector<64x128xf32>
    %32 = arith.addf %31, %7 : vector<64x128xf32>
    %c0_19 = arith.constant 0 : index
    %c0_20 = arith.constant 0 : index
    %33 = vector.load %arg8[%c0_19, %c0_20] : memref<64x128xf32, #tpu.memory_space<vmem>>, vector<64x128xf32>
    tpu.vector_store %arg8[%c0_19, %c0_20], %32 {strides = array<i32>} : memref<64x128xf32, #tpu.memory_space<vmem>>, vector<64x128xf32>,
    return
  }
  func.func @transform_0(%arg0: i32) -> (i32, i32) {
    %c0_i32 = arith.constant 0 : i32
    %c0_i32_0 = arith.constant 0 : i32
    return %arg0, %c0_i32 : i32, i32
  }
  func.func @transform_1(%arg0: i32) -> (i32, i32) {
    %c0_i32 = arith.constant 0 : i32
    %c0_i32_0 = arith.constant 0 : i32
    %c0_i32_1 = arith.constant 0 : i32
    return %c0_i32, %c0_i32_0 : i32, i32
  }
  func.func @transform_2(%arg0: i32) -> (i32, i32) {
    %c0_i32 = arith.constant 0 : i32
    %c0_i32_0 = arith.constant 0 : i32
    %c0_i32_1 = arith.constant 0 : i32
    return %c0_i32, %c0_i32_0 : i32, i32
  }
  func.func @transform_3(%arg0: i32) -> (i32, i32) {
    %c0_i32 = arith.constant 0 : i32
    %c0_i32_0 = arith.constant 0 : i32
    %c0_i32_1 = arith.constant 0 : i32
    return %c0_i32, %c0_i32_0 : i32, i32
  }
  func.func @transform_4(%arg0: i32) -> (i32, i32) {
    %c0_i32 = arith.constant 0 : i32
    %c0_i32_0 = arith.constant 0 : i32
    %c0_i32_1 = arith.constant 0 : i32
    return %c0_i32, %c0_i32_0 : i32, i32
  }
  func.func @transform_5(%arg0: i32) -> (i32, i32) {
    %c0_i32 = arith.constant 0 : i32
    %c0_i32_0 = arith.constant 0 : i32
    %c0_i32_1 = arith.constant 0 : i32
    return %c0_i32, %c0_i32_0 : i32, i32
  }
  func.func @transform_6(%arg0: i32) -> (i32, i32) {
    %c0_i32 = arith.constant 0 : i32
    %c0_i32_0 = arith.constant 0 : i32
    %c0_i32_1 = arith.constant 0 : i32
    return %c0_i32, %c0_i32_0 : i32, i32
  }
  func.func @transform_7(%arg0: i32) -> (i32, i32) {
    %c0_i32 = arith.constant 0 : i32
    %c0_i32_0 = arith.constant 0 : i32
    return %arg0, %c0_i32 : i32, i32
  }
}

module attributes {stable_mosaic.version = 11 : i64} {
  func.func @_phi_w_kernel(%arg0: i32, %arg1: memref<64x128xf32, #tpu.memory_space<vmem>>, %arg2: memref<128x256xf32, #tpu.memory_space<vmem>>, %arg3: memref<1x256xf32, #tpu.memory_space<vmem>>, %arg4: memref<128x128xf32, #tpu.memory_space<vmem>>, %arg5: memref<1x128xf32, #tpu.memory_space<vmem>>, %arg6: memref<128x128xf32, #tpu.memory_space<vmem>>, %arg7: memref<1x128xf32, #tpu.memory_space<vmem>>, %arg8: memref<64x128xf32, #tpu.memory_space<vmem>>) attributes {dimension_semantics = [#tpu.dimension_semantics<parallel>], iteration_bounds = array<i64: 1>, scalar_prefetch = 0 : i64, scratch_operands = 0 : i64, tpu.core_type = #tpu.core_type<tc>, window_params = [{transform_indices = @transform_0, window_bounds = array<i64: 64, 128>}, {pipeline_mode = #tpu.pipeline_mode<synchronous>, transform_indices = @transform_1, window_bounds = array<i64: 128, 256>}, {pipeline_mode = #tpu.pipeline_mode<synchronous>, transform_indices = @transform_2, window_bounds = array<i64: 1, 256>}, {pipeline_mode = #tpu.pipeline_mode<synchronous>, transform_indices = @transform_3, window_bounds = array<i64: 128, 128>}, {pipeline_mode = #tpu.pipeline_mode<synchronous>, transform_indices = @transform_4, window_bounds = array<i64: 1, 128>}, {pipeline_mode = #tpu.pipeline_mode<synchronous>, transform_indices = @transform_5, window_bounds = array<i64: 128, 128>}, {pipeline_mode = #tpu.pipeline_mode<synchronous>, transform_indices = @transform_6, window_bounds = array<i64: 1, 128>}, {transform_indices = @transform_7, window_bounds = array<i64: 64, 128>}]} {
    %c0 = arith.constant 0 : index
    %c0_0 = arith.constant 0 : index
    %0 = vector.load %arg1[%c0, %c0_0] : memref<64x128xf32, #tpu.memory_space<vmem>>, vector<64x128xf32>
    %c0_1 = arith.constant 0 : index
    %c0_2 = arith.constant 0 : index
    %1 = vector.load %arg2[%c0_1, %c0_2] : memref<128x256xf32, #tpu.memory_space<vmem>>, vector<128x256xf32>
    %cst = arith.constant dense<0.000000e+00> : vector<64x256xf32>
    %2 = tpu.matmul %0, %1, %cst {dimension_numbers = #tpu.dot_dimension_numbers<[1], [0], [0], [1], [0, 0, 1, 1], [], []>} : vector<64x128xf32>, vector<128x256xf32>, vector<64x256xf32> -> vector<64x256xf32>
    %c0_3 = arith.constant 0 : index
    %c0_4 = arith.constant 0 : index
    %3 = vector.load %arg3[%c0_3, %c0_4] : memref<1x256xf32, #tpu.memory_space<vmem>>, vector<1x256xf32>
    %4 = vector.broadcast %3 : vector<1x256xf32> to vector<64x256xf32>
    %5 = arith.addf %2, %4 : vector<64x256xf32>
    %6 = vector.extract_strided_slice %5 {offsets = [0, 0], sizes = [64, 128], strides = [1, 1]} : vector<64x256xf32> to vector<64x128xf32>
    %7 = vector.extract_strided_slice %5 {offsets = [0, 128], sizes = [64, 128], strides = [1, 1]} : vector<64x256xf32> to vector<64x128xf32>
    %cst_5 = arith.constant 2.000000e+01 : f32
    %8 = vector.broadcast %cst_5 : f32 to vector<64x128xf32>
    %9 = arith.cmpf ogt, %6, %8 : vector<64x128xf32>
    %cst_6 = arith.constant 2.000000e+01 : f32
    %10 = vector.broadcast %cst_6 : f32 to vector<64x128xf32>
    %11 = arith.minimumf %6, %10 : vector<64x128xf32>
    %12 = math.exp %11 : vector<64x128xf32>
    %13 = math.log1p %12 : vector<64x128xf32>
    %14 = arith.select %9, %6, %13 : vector<64x128xi1>, vector<64x128xf32>
    %c0_7 = arith.constant 0 : index
    %c0_8 = arith.constant 0 : index
    %15 = vector.load %arg4[%c0_7, %c0_8] : memref<128x128xf32, #tpu.memory_space<vmem>>, vector<128x128xf32>
    %cst_9 = arith.constant dense<0.000000e+00> : vector<64x128xf32>
    %16 = tpu.matmul %14, %15, %cst_9 {dimension_numbers = #tpu.dot_dimension_numbers<[1], [0], [0], [1], [0, 0, 1, 1], [], []>} : vector<64x128xf32>, vector<128x128xf32>, vector<64x128xf32> -> vector<64x128xf32>
    %c0_10 = arith.constant 0 : index
    %c0_11 = arith.constant 0 : index
    %17 = vector.load %arg5[%c0_10, %c0_11] : memref<1x128xf32, #tpu.memory_space<vmem>>, vector<1x128xf32>
    %18 = vector.broadcast %17 : vector<1x128xf32> to vector<64x128xf32>
    %19 = arith.addf %16, %18 : vector<64x128xf32>
    %cst_12 = arith.constant 2.000000e+01 : f32
    %20 = vector.broadcast %cst_12 : f32 to vector<64x128xf32>
    %21 = arith.cmpf ogt, %19, %20 : vector<64x128xf32>
    %cst_13 = arith.constant 2.000000e+01 : f32
    %22 = vector.broadcast %cst_13 : f32 to vector<64x128xf32>
    %23 = arith.minimumf %19, %22 : vector<64x128xf32>
    %24 = math.exp %23 : vector<64x128xf32>
    %25 = math.log1p %24 : vector<64x128xf32>
    %26 = arith.select %21, %19, %25 : vector<64x128xi1>, vector<64x128xf32>
    %c0_14 = arith.constant 0 : index
    %c0_15 = arith.constant 0 : index
    %27 = vector.load %arg6[%c0_14, %c0_15] : memref<128x128xf32, #tpu.memory_space<vmem>>, vector<128x128xf32>
    %cst_16 = arith.constant dense<0.000000e+00> : vector<64x128xf32>
    %28 = tpu.matmul %26, %27, %cst_16 {dimension_numbers = #tpu.dot_dimension_numbers<[1], [0], [0], [1], [0, 0, 1, 1], [], []>} : vector<64x128xf32>, vector<128x128xf32>, vector<64x128xf32> -> vector<64x128xf32>
    %c0_17 = arith.constant 0 : index
    %c0_18 = arith.constant 0 : index
    %29 = vector.load %arg7[%c0_17, %c0_18] : memref<1x128xf32, #tpu.memory_space<vmem>>, vector<1x128xf32>
    %30 = vector.broadcast %29 : vector<1x128xf32> to vector<64x128xf32>
    %31 = arith.addf %28, %30 : vector<64x128xf32>
    %32 = arith.addf %31, %7 : vector<64x128xf32>
    %c0_19 = arith.constant 0 : index
    %c0_20 = arith.constant 0 : index
    %33 = vector.load %arg8[%c0_19, %c0_20] : memref<64x128xf32, #tpu.memory_space<vmem>>, vector<64x128xf32>
    tpu.vector_store %arg8[%c0_19, %c0_20], %32 {strides = array<i32>} : memref<64x128xf32, #tpu.memory_space<vmem>>, vector<64x128xf32>,
    return
  }
  func.func @transform_0(%arg0: i32) -> (i32, i32) {
    %c0_i32 = arith.constant 0 : i32
    %c0_i32_0 = arith.constant 0 : i32
    return %arg0, %c0_i32 : i32, i32
  }
  func.func @transform_1(%arg0: i32) -> (i32, i32) {
    %c0_i32 = arith.constant 0 : i32
    %c0_i32_0 = arith.constant 0 : i32
    %c0_i32_1 = arith.constant 0 : i32
    return %c0_i32, %c0_i32_0 : i32, i32
  }
  func.func @transform_2(%arg0: i32) -> (i32, i32) {
    %c0_i32 = arith.constant 0 : i32
    %c0_i32_0 = arith.constant 0 : i32
    %c0_i32_1 = arith.constant 0 : i32
    return %c0_i32, %c0_i32_0 : i32, i32
  }
  func.func @transform_3(%arg0: i32) -> (i32, i32) {
    %c0_i32 = arith.constant 0 : i32
    %c0_i32_0 = arith.constant 0 : i32
    %c0_i32_1 = arith.constant 0 : i32
    return %c0_i32, %c0_i32_0 : i32, i32
  }
  func.func @transform_4(%arg0: i32) -> (i32, i32) {
    %c0_i32 = arith.constant 0 : i32
    %c0_i32_0 = arith.constant 0 : i32
    %c0_i32_1 = arith.constant 0 : i32
    return %c0_i32, %c0_i32_0 : i32, i32
  }
  func.func @transform_5(%arg0: i32) -> (i32, i32) {
    %c0_i32 = arith.constant 0 : i32
    %c0_i32_0 = arith.constant 0 : i32
    %c0_i32_1 = arith.constant 0 : i32
    return %c0_i32, %c0_i32_0 : i32, i32
  }
  func.func @transform_6(%arg0: i32) -> (i32, i32) {
    %c0_i32 = arith.constant 0 : i32
    %c0_i32_0 = arith.constant 0 : i32
    %c0_i32_1 = arith.constant 0 : i32
    return %c0_i32, %c0_i32_0 : i32, i32
  }
  func.func @transform_7(%arg0: i32) -> (i32, i32) {
    %c0_i32 = arith.constant 0 : i32
    %c0_i32_0 = arith.constant 0 : i32
    return %arg0, %c0_i32 : i32, i32
  }
}

</mosaic_0001>

<bundles_post_ra>
// kernel: tpu_custom_call.1
= control target key start
LH: loop header
LB: loop body
LE: loop exit
PB: predicated region body
PF: predicated region fallthrough
CT: control target
= control target key end

     0   :  { %12 = vsyncpa [#allocation3], 0  ;;  %s1474_s0 = inlined_call_operand.hbm [shape: f32[64,128], index: 0, kind: input, shape index: {}]   ;;  %s1475_s1 = inlined_call_operand.hbm [shape: f32[128,256], index: 1, kind: input, shape index: {}]   ;;  %s1476_s2 = inlined_call_operand.vmem [shape: f32[1,256], index: 2, kind: input, shape index: {}]   ;;  %s1477_s3 = inlined_call_operand.hbm [shape: f32[128,128], index: 3, kind: input, shape index: {}]   ;;  %s1478_s4 = inlined_call_operand.vmem [shape: f32[1,128], index: 4, kind: input, shape index: {}]   ;;  %s1479_s5 = inlined_call_operand.hbm [shape: f32[128,128], index: 5, kind: input, shape index: {}]   ;;  %s1480_s6 = inlined_call_operand.vmem [shape: f32[1,128], index: 6, kind: input, shape index: {}]   ;;  %s1481_s7 = inlined_call_operand.hbm [shape: f32[64,128], index: 7, kind: output, shape index: {}]  }
   0x1   :  { %13 = vsyncpa [#allocation6], 0 }
   0x2   :  { %14 = vsyncpa [#allocation9], 0 }
   0x3   :  { %15 = vsyncpa [#allocation4], 0  ;;  %s1204_s24 = smov [#allocation5]   ;;  %s1086_s28 = scalar_lea.hbm %s1475_s1, 4096 }
   0x4   :  { %s33_s25 = sshll.u32 %s1204_s24, 4  ;;  %p1087_p0 = scmp.ne.s32.totalorder %s1475_s1, %s1086_s28  ;;  %s34_s25 = int_to_ptr.vmem [resolvable:$true] %s33_s25 }
   0x5   :  { %p1090_p1 = scmp.lt.u32.totalorder %s1086_s28, %s1475_s1 }
   0x7   :  { %p1092_p2 = pnand %p1090_p1, %p1087_p0 }
   0x9   :  { %1095 = shalt.err (!%p1092_p2)
}
   0xa   :  { %s1096_s10 = scalar_lea.vmem %s34_s25, 4096  ;;  %p1101_p4 = scmp.lt.s32.totalorder %s34_s25, %s34_s25 }
   0xb   :  { %p1097_p3 = scmp.ne.s32.totalorder %s34_s25, %s1096_s10  ;;  %p1102_p5 = scmp.lt.s32.totalorder %s1096_s10, %s1096_s10 }
   0xd   :  { %p1103_p6 = por %p1102_p5, %p1101_p4 }
   0xf   :  { %p1104_p7 = pnand %p1103_p6, %p1097_p3 }
  0x11   :  { %1107 = shalt.err (!%p1104_p7)
}
  0x12   :  { %s1205_s11 = smov 256   ;;  %s1206_s12 = smov 16  }
  0x13   :  { %39 = dma.hbm_to_vmem [thread:$0]  %s1475_s1, 4096, %s34_s25, [#allocation6], %s1205_s11, %s1205_s11, %s1206_s12  }
  0x14   :  { %s1207_s15 = smov [#allocation2]   ;;  %s1108_s19 = scalar_lea.hbm %s1474_s0, 1024 }
  0x15   :  { %s21_s16 = sshll.u32 %s1207_s15, 4  ;;  %p1109_p8 = scmp.ne.s32.totalorder %s1474_s0, %s1108_s19  ;;  %s22_s16 = int_to_ptr.vmem [resolvable:$true] %s21_s16 }
  0x16   :  { %p1112_p9 = scmp.lt.u32.totalorder %s1108_s19, %s1474_s0 }
  0x18   :  { %p1114_p10 = pnand %p1112_p9, %p1109_p8 }
  0x1a   :  { %1117 = shalt.err (!%p1114_p10)
}
  0x1b   :  { %s1118_s24 = scalar_lea.vmem %s22_s16, 1024  ;;  %p1123_p12 = scmp.lt.s32.totalorder %s22_s16, %s22_s16 }
  0x1c   :  { %p1119_p11 = scmp.ne.s32.totalorder %s22_s16, %s1118_s24  ;;  %p1124_p13 = scmp.lt.s32.totalorder %s1118_s24, %s1118_s24 }
  0x1e   :  { %p1125_p0 = por %p1124_p13, %p1123_p12 }
  0x20   :  { %p1126_p1 = pnand %p1125_p0, %p1119_p11 }
  0x22   :  { %1129 = shalt.err (!%p1126_p1)
}
  0x23   :  { %s1208_s1 = smov 128   ;;  %s1209_s25 = smov 8  }
  0x24   :  { %27 = dma.hbm_to_vmem [thread:$0]  %s1474_s0, 1024, %s22_s16, [#allocation3], %s1208_s1, %s1208_s1, %s1209_s25  }
  0x25   :  { %s1210_s28 = smov [#allocation7]   ;;  %s1211_s30 = smov [#allocation8]  }
  0x26   :  { %s47_s29 = sshll.u32 %s1210_s28, 4  ;;  %s61_s8 = sshll.u32 %s1211_s30, 4  ;;  %s48_s29 = int_to_ptr.vmem [resolvable:$true] %s47_s29  ;;  %s1281_s8 = int_to_ptr.vmem [resolvable:$true] %s61_s8 }
  0x27   :  { %s1130_s11 = scalar_lea.hbm %s1477_s3, 2048 }
  0x28   :  { %p1131_p2 = scmp.ne.s32.totalorder %s1477_s3, %s1130_s11  ;;  %p1134_p3 = scmp.lt.u32.totalorder %s1130_s11, %s1477_s3 }
  0x2a   :  { %p1136_p4 = pnand %p1134_p3, %p1131_p2 }
  0x2c   :  { %1139 = shalt.err (!%p1136_p4)
}
  0x2d   :  { %s1140_s0 = scalar_lea.vmem %s48_s29, 2048  ;;  %p1145_p6 = scmp.lt.s32.totalorder %s48_s29, %s48_s29 }
  0x2e   :  { %p1141_p5 = scmp.ne.s32.totalorder %s48_s29, %s1140_s0  ;;  %p1146_p7 = scmp.lt.s32.totalorder %s1140_s0, %s1140_s0 }
  0x30   :  { %p1147_p8 = por %p1146_p7, %p1145_p6 }
  0x32   :  { %p1148_p9 = pnand %p1147_p8, %p1141_p5 }
  0x34   :  { %1151 = shalt.err (!%p1148_p9)
}
  0x35   :  { %53 = dma.hbm_to_vmem [thread:$0]  %s1477_s3, 2048, %s48_s29, [#allocation6], %s1208_s1, %s1208_s1, %s1209_s25  }
  0x36   :  { %s1152_s20 = scalar_lea.hbm %s1479_s5, 2048 }
  0x37   :  { %p1153_p10 = scmp.ne.s32.totalorder %s1479_s5, %s1152_s20  ;;  %p1156_p11 = scmp.lt.u32.totalorder %s1152_s20, %s1479_s5 }
  0x39   :  { %p1158_p12 = pnand %p1156_p11, %p1153_p10 }
  0x3b   :  { %1161 = shalt.err (!%p1158_p12)
}
  0x3c   :  { %s1162_s26 = scalar_lea.vmem %s1281_s8, 2048  ;;  %p1167_p0 = scmp.lt.s32.totalorder %s1281_s8, %s1281_s8 }
  0x3d   :  { %p1163_p13 = scmp.ne.s32.totalorder %s1281_s8, %s1162_s26  ;;  %p1168_p1 = scmp.lt.s32.totalorder %s1162_s26, %s1162_s26 }
  0x3f   :  { %p1169_p2 = por %p1168_p1, %p1167_p0 }
  0x41   :  { %p1170_p3 = pnand %p1169_p2, %p1163_p13 }
  0x43   :  { %1173 = shalt.err (!%p1170_p3)
}
  0x44   :  { %67 = dma.hbm_to_vmem [thread:$0]  %s1479_s5, 2048, %s1281_s8, [#allocation9], %s1208_s1, %s1208_s1, %s1209_s25  }
  0x45   :  { %1196 = dma.done.wait [#allocation3], 1024  }
  0x46   :  { %1197 = vsyncadd [#allocation3], 4294966272 }
  0x47   :  { %1198 = dma.done.wait [#allocation6], 6144  }
  0x48   :  { %1199 = vsyncadd [#allocation6], 4294961152 }
  0x49   :  { %1200 = dma.done.wait [#allocation9], 2048  }
  0x4a   :  { %1201 = vsyncadd [#allocation9], 4294965248  ;;  %v1212_v0 = vmov 0.0   ;;  %v91_v1 = vld [vmem:[#allocation5 + $0x8] sm:$0xff]  ;;  %v93_v2 = vld [vmem:[#allocation5 + $0x18] sm:$0xff] }
  0x4b   :  { %198 = vmatprep.mubr.f32.mxu0 %v1212_v0  ;;  %v90_v3 = vld [vmem:[#allocation5] sm:$0xff]  ;;  %v900_v4 = vpack.c.bf16 %v93_v2, %v91_v1  ;;  %v92_v5 = vld [vmem:[#allocation5 + $0x10] sm:$0xff]  ;;  %v95_v6 = vld [vmem:[#allocation5 + $0x28] sm:$0xff] }
  0x4c   :  { %v97_v7 = vld [vmem:[#allocation5 + $0x38] sm:$0xff]  ;;  %v902_v8 = vpack.c.bf16 %v92_v5, %v90_v3  ;;  %v94_v10 = vld [vmem:[#allocation5 + $0x20] sm:$0xff]  ;;  %v96_v11 = vld [vmem:[#allocation5 + $0x30] sm:$0xff] }
  0x4d   :  { %v904_v9 = vpack.c.bf16 %v97_v7, %v95_v6  ;;  %v99_v12 = vld [vmem:[#allocation5 + $0x48] sm:$0xff]  ;;  %901 = vmatprep.subr.bf16.mxu0 %v900_v4  ;;  %v101_v13 = vld [vmem:[#allocation5 + $0x58] sm:$0xff]  ;;  %v906_v14 = vpack.c.bf16 %v96_v11, %v94_v10  ;;  %v98_v16 = vld [vmem:[#allocation5 + $0x40] sm:$0xff] }
  0x4e   :  { %903 = vmatpush1.bf16.msra.mxu0 %v902_v8  ;;  %v908_v15 = vpack.c.bf16 %v101_v13, %v99_v12  ;;  %v100_v17 = vld [vmem:[#allocation5 + $0x50] sm:$0xff]  ;;  %v103_v18 = vld [vmem:[#allocation5 + $0x68] sm:$0xff]  ;;  %v105_v19 = vld [vmem:[#allocation5 + $0x78] sm:$0xff] }
  0x4f   :  { %905 = vmatprep.subr.bf16.mxu0 %v904_v9  ;;  %v910_v20 = vpack.c.bf16 %v100_v17, %v98_v16  ;;  %v912_v21 = vpack.c.bf16 %v105_v19, %v103_v18  ;;  %v102_v22 = vld [vmem:[#allocation5 + $0x60] sm:$0xff]  ;;  %v104_v23 = vld [vmem:[#allocation5 + $0x70] sm:$0xff]  ;;  %v107_v24 = vld [vmem:[#allocation5 + $0x88] sm:$0xff]  ;;  %v124_v17 = vlaneseq }
  0x50   :  { %v109_v25 = vld [vmem:[#allocation5 + $0x98] sm:$0xff]  ;;  %v914_v26 = vpack.c.bf16 %v104_v23, %v102_v22  ;;  %v106_v28 = vld [vmem:[#allocation5 + $0x80] sm:$0xff]  ;;  %v108_v29 = vld [vmem:[#allocation5 + $0x90] sm:$0xff] }
  0x51   :  { %v916_v27 = vpack.c.bf16 %v109_v25, %v107_v24  ;;  %v111_v30 = vld [vmem:[#allocation5 + $0xa8] sm:$0xff]  ;;  %v113_v31 = vld [vmem:[#allocation5 + $0xb8] sm:$0xff]  ;;  %v918_v32 = vpack.c.bf16 %v108_v29, %v106_v28  ;;  %v110_v34 = vld [vmem:[#allocation5 + $0xa0] sm:$0xff]  ;;  %v1326_v18 = vshrl.u32 %v124_v17, 7 }
  0x52   :  { %907 = vmatpush1.bf16.msra.mxu0 %v906_v14  ;;  %v920_v33 = vpack.c.bf16 %v113_v31, %v111_v30  ;;  %v112_v35 = vld [vmem:[#allocation5 + $0xb0] sm:$0xff]  ;;  %v115_v36 = vld [vmem:[#allocation5 + $0xc8] sm:$0xff]  ;;  %v117_v37 = vld [vmem:[#allocation5 + $0xd8] sm:$0xff] }
  0x53   :  { %909 = vmatprep.subr.bf16.mxu0 %v908_v15  ;;  %v922_v38 = vpack.c.bf16 %v112_v35, %v110_v34  ;;  %v924_v39 = vpack.c.bf16 %v117_v37, %v115_v36  ;;  %v114_v40 = vld [vmem:[#allocation5 + $0xc0] sm:$0xff]  ;;  %v116_v41 = vld [vmem:[#allocation5 + $0xd0] sm:$0xff]  ;;  %v119_v42 = vld [vmem:[#allocation5 + $0xe8] sm:$0xff]  ;;  %v126_v19 = vsub.s32 0, %v1326_v18 }
  0x54   :  { %v121_v43 = vld [vmem:[#allocation5 + $0xf8] sm:$0xff]  ;;  %v926_v44 = vpack.c.bf16 %v116_v41, %v114_v40  ;;  %v118_v46 = vld [vmem:[#allocation5 + $0xe0] sm:$0xff]  ;;  %v120_v47 = vld [vmem:[#allocation5 + $0xf0] sm:$0xff] }
  0x55   :  { %v928_v45 = vpack.c.bf16 %v121_v43, %v119_v42  ;;  %v930_v48 = vpack.c.bf16 %v120_v47, %v118_v46  ;;  %v82_v49 = vld [vmem:[#allocation2] sm:$0xff]  ;;  %v83_v50 = vld [vmem:[#allocation2 + $0x8] sm:$0xff]  ;;  %v84_v51 = vld [vmem:[#allocation2 + $0x10] sm:$0xff] }
  0x56   :  { %911 = vmatpush1.bf16.msra.mxu0 %v910_v20  ;;  %v85_v52 = vld [vmem:[#allocation2 + $0x18] sm:$0xff]  ;;  %v86_v53 = vld [vmem:[#allocation2 + $0x20] sm:$0xff]  ;;  %v87_v54 = vld [vmem:[#allocation2 + $0x28] sm:$0xff] }
  0x57   :  { %913 = vmatprep.subr.bf16.mxu0 %v912_v21  ;;  %v88_v55 = vld [vmem:[#allocation2 + $0x30] sm:$0xff]  ;;  %v89_v56 = vld [vmem:[#allocation2 + $0x38] sm:$0xff]  ;;  %v359_v57 = vld [vmem:[#allocation7] sm:$0xff] }
  0x58   :  { %v360_v58 = vld [vmem:[#allocation7 + $0x8] sm:$0xff]  ;;  %v361_v60 = vld [vmem:[#allocation7 + $0x10] sm:$0xff]  ;;  %v362_v61 = vld [vmem:[#allocation7 + $0x18] sm:$0xff] }
  0x59   :  { %v932_v59 = vpack.c.bf16 %v360_v58, %v359_v57  ;;  %v936_v62 = vpack.c.bf16 %v362_v61, %v361_v60  ;;  %v363_v63 = vld [vmem:[#allocation7 + $0x20] sm:$0xff]  ;;  %v364_v1 = vld [vmem:[#allocation7 + $0x28] sm:$0xff]  ;;  %v365_v3 = vld [vmem:[#allocation7 + $0x30] sm:$0xff] }
  0x5a   :  { %915 = vmatpush1.bf16.msra.mxu0 %v914_v26  ;;  %v940_v2 = vpack.c.bf16 %v364_v1, %v363_v63  ;;  %v366_v4 = vld [vmem:[#allocation7 + $0x38] sm:$0xff]  ;;  %v367_v5 = vld [vmem:[#allocation7 + $0x40] sm:$0xff]  ;;  %v368_v6 = vld [vmem:[#allocation7 + $0x48] sm:$0xff] }
  0x5b   :  { %917 = vmatprep.subr.bf16.mxu0 %v916_v27  ;;  %933 = vmatprep.subr.bf16.mxu1 %v932_v59  ;;  %v948_v7 = vpack.c.bf16 %v368_v6, %v367_v5  ;;  %v369_v8 = vld [vmem:[#allocation7 + $0x50] sm:$0xff]  ;;  %v370_v9 = vld [vmem:[#allocation7 + $0x58] sm:$0xff]  ;;  %v371_v11 = vld [vmem:[#allocation7 + $0x60] sm:$0xff] }
  0x5c   :  { %935 = vmatpush3.bf16.msra.mxu1 %v932_v59  ;;  %v952_v10 = vpack.c.bf16 %v370_v9, %v369_v8  ;;  %v372_v12 = vld [vmem:[#allocation7 + $0x68] sm:$0xff]  ;;  %v373_v14 = vld [vmem:[#allocation7 + $0x70] sm:$0xff]  ;;  %v374_v15 = vld [vmem:[#allocation7 + $0x78] sm:$0xff] }
  0x5d   :  { %937 = vmatprep.subr.bf16.mxu1 %v936_v62  ;;  %v956_v13 = vpack.c.bf16 %v372_v12, %v371_v11  ;;  %v960_v16 = vpack.c.bf16 %v374_v15, %v373_v14  ;;  %v1332_v20 = vld [vmem:[%s1476_s2] sm:$0x3] }
  0x5e   :  { %919 = vmatpush1.bf16.msra.mxu0 %v918_v32  ;;  %v127_v21 = vrot.slane %v1332_v20, %v126_v19 }
  0x5f   :  { %921 = vmatprep.subr.bf16.mxu0 %v920_v33 }
  0x60   :  { %939 = vmatpush3.bf16.msra.mxu1 %v936_v62 }
  0x61   :  { %941 = vmatprep.subr.bf16.mxu1 %v940_v2 }
  0x62   :  { %923 = vmatpush1.bf16.msra.mxu0 %v922_v38 }
  0x63   :  { %925 = vmatprep.subr.bf16.mxu0 %v924_v39 }
  0x64   :  { %943 = vmatpush3.bf16.msra.mxu1 %v940_v2 }
  0x66   :  { %927 = vmatpush1.bf16.msra.mxu0 %v926_v44 }
  0x67   :  { %929 = vmatprep.subr.bf16.mxu0 %v928_v45 }
  0x6a   :  { %931 = vmatpush1.bf16.msra.mxu0 %v930_v48 }
  0x6d   :  { %199 = vmatmul.mubr.f32.vlgmr.msra.gmra.mrb[0].mxu0 %v82_v49 }
  0x6e   :  { %204 = vmatprep.mubr.f32.mxu0 %v1212_v0 }
  0x71   :  { %205 = vmatmul.mubr.f32.gmra.mrb[2].mxu0 %v83_v50 }
  0x72   :  { %210 = vmatprep.mubr.f32.mxu0 %v1212_v0 }
  0x75   :  { %211 = vmatmul.mubr.f32.gmra.mrb[4].mxu0 %v84_v51 }
  0x76   :  { %216 = vmatprep.mubr.f32.mxu0 %v1212_v0 }
  0x79   :  { %217 = vmatmul.mubr.f32.gmra.mrb[6].mxu0 %v85_v52 }
  0x7a   :  { %222 = vmatprep.mubr.f32.mxu0 %v1212_v0 }
  0x7d   :  { %223 = vmatmul.mubr.f32.gmra.mrb[8].mxu0 %v86_v53 }
  0x7e   :  { %228 = vmatprep.mubr.f32.mxu0 %v1212_v0 }
  0x81   :  { %229 = vmatmul.mubr.f32.gmra.mrb[10].mxu0 %v87_v54 }
  0x82   :  { %234 = vmatprep.mubr.f32.mxu0 %v1212_v0 }
  0x85   :  { %235 = vmatmul.mubr.f32.gmra.mrb[12].mxu0 %v88_v55 }
  0x86   :  { %240 = vmatprep.mubr.f32.mxu0 %v1212_v0  ;;  %v944_v0 = vpack.c.bf16 %v366_v4, %v365_v3 }
  0x88   :  { %945 = vmatprep.subr.bf16.mxu1 %v944_v0 }
  0x89   :  { %241 = vmatmul.mubr.f32.gmra.mrb[14].mxu0 %v89_v56  ;;  %947 = vmatpush3.bf16.msra.mxu1 %v944_v0 }
  0x8a   :  { %949 = vmatprep.subr.bf16.mxu1 %v948_v7 }
  0x8d   :  { %951 = vmatpush3.bf16.msra.mxu1 %v948_v7 }
  0x8e   :  { %953 = vmatprep.subr.bf16.mxu1 %v952_v10 }
  0x91   :  { %955 = vmatpush3.bf16.msra.mxu1 %v952_v10 }
  0x92   :  { %957 = vmatprep.subr.bf16.mxu1 %v956_v13 }
  0x95   :  { %959 = vmatpush3.bf16.msra.mxu1 %v956_v13 }
  0x96   :  { %961 = vmatprep.subr.bf16.mxu1 %v960_v16 }
  0x99   :  { %963 = vmatpush3.bf16.msra.mxu1 %v960_v16 }
 0x140   :  { %v200_v22 = vpop.f32.mrb[0].mxu0 }
 0x141   :  { %v1335_v23 = vadd.f32 %v200_v22, %v127_v21  ;;  %v1337_v24 = vpop.f32.mrb[1].mxu0 }
 0x143   :  { %v255_v25 = vmin.f32 %v1335_v23, 20.0  ;;  %vm247_vm1 = vcmp.gt.f32.partialorder %v1335_v23, 20.0 }
 0x144   :  { %v206_v26 = vpop.f32.mrb[2].mxu0 }
 0x145   :  { %v263_v27 = vmul.f32 1.442695, %v255_v25  ;;  %v1340_v28 = vadd.f32 %v206_v26, %v127_v21  ;;  %v1342_v29 = vpop.f32.mrb[3].mxu0 }
 0x147   :  { %1022 = vpow2.f32 %v263_v27  ;;  %v256_v30 = vmin.f32 %v1340_v28, 20.0  ;;  %vm248_vm3 = vcmp.gt.f32.partialorder %v1340_v28, 20.0 }
 0x148   :  { %v212_v31 = vpop.f32.mrb[4].mxu0 }
 0x149   :  { %v265_v32 = vmul.f32 1.442695, %v256_v30  ;;  %v1345_v33 = vadd.f32 %v212_v31, %v127_v21  ;;  %v1347_v34 = vpop.f32.mrb[5].mxu0 }
 0x14b   :  { %1024 = vpow2.f32 %v265_v32  ;;  %v257_v35 = vmin.f32 %v1345_v33, 20.0  ;;  %vm249_vm5 = vcmp.gt.f32.partialorder %v1345_v33, 20.0 }
 0x14c   :  { %v218_v36 = vpop.f32.mrb[6].mxu0 }
 0x14d   :  { %v267_v37 = vmul.f32 1.442695, %v257_v35  ;;  %v1350_v38 = vadd.f32 %v218_v36, %v127_v21  ;;  %v1352_v39 = vpop.f32.mrb[7].mxu0 }
 0x14f   :  { %1026 = vpow2.f32 %v267_v37  ;;  %v258_v40 = vmin.f32 %v1350_v38, 20.0  ;;  %vm250_vm7 = vcmp.gt.f32.partialorder %v1350_v38, 20.0 }
 0x150   :  { %v224_v41 = vpop.f32.mrb[8].mxu0 }
 0x151   :  { %v1023_v42 = vpop.eup %1022  ;;  %v269_v43 = vmul.f32 1.442695, %v258_v40  ;;  %v1355_v44 = vadd.f32 %v224_v41, %v127_v21  ;;  %v1357_v45 = vpop.f32.mrb[9].mxu0 }
 0x152   :  { %v279_v46 = vadd.f32 1.0, %v1023_v42  ;;  %v282_v53 = vmul.f32 -0.5, %v1023_v42  ;;  %v285_v3 = vand.u32 2147483647, %v1023_v42 }
 0x153   :  { %1028 = vpow2.f32 %v269_v43  ;;  %v259_v47 = vmin.f32 %v1355_v44, 20.0  ;;  %vm251_vm9 = vcmp.gt.f32.partialorder %v1355_v44, 20.0 }
 0x154   :  { %v230_v48 = vpop.f32.mrb[10].mxu0  ;;  %1030 = vlog2.f32 %v279_v46  ;;  %v283_v61 = vadd.f32 1.0, %v282_v53  ;;  %vm286_vm0 = vcmp.lt.f32.partialorder %v285_v3, 0.0004427343 }
 0x155   :  { %v1025_v49 = vpop.eup %1024  ;;  %v271_v50 = vmul.f32 1.442695, %v259_v47  ;;  %v1360_v51 = vadd.f32 %v230_v48, %v127_v21  ;;  %v1362_v52 = vpop.f32.mrb[11].mxu0 }
 0x156   :  { %v288_v54 = vadd.f32 1.0, %v1025_v49  ;;  %v291_v62 = vmul.f32 -0.5, %v1025_v49  ;;  %v284_v8 = vmul.f32 %v1023_v42, %v283_v61  ;;  %v294_v14 = vand.u32 2147483647, %v1025_v49 }
 0x157   :  { %1032 = vpow2.f32 %v271_v50  ;;  %v260_v55 = vmin.f32 %v1360_v51, 20.0  ;;  %vm252_vm11 = vcmp.gt.f32.partialorder %v1360_v51, 20.0 }
 0x158   :  { %v236_v56 = vpop.f32.mrb[12].mxu0  ;;  %1034 = vlog2.f32 %v288_v54  ;;  %v292_v9 = vadd.f32 1.0, %v291_v62  ;;  %vm295_vm2 = vcmp.lt.f32.partialorder %v294_v14, 0.0004427343 }
 0x159   :  { %v1027_v57 = vpop.eup %1026  ;;  %v273_v58 = vmul.f32 1.442695, %v260_v55  ;;  %v1365_v59 = vadd.f32 %v236_v56, %v127_v21  ;;  %v1367_v60 = vpop.f32.mrb[13].mxu0 }
 0x15a   :  { %v297_v63 = vadd.f32 1.0, %v1027_v57  ;;  %v300_v13 = vmul.f32 -0.5, %v1027_v57  ;;  %v293_v22 = vmul.f32 %v1025_v49, %v292_v9  ;;  %v303_v31 = vand.u32 2147483647, %v1027_v57 }
 0x15b   :  { %1036 = vpow2.f32 %v273_v58  ;;  %v261_v1 = vmin.f32 %v1365_v59, 20.0  ;;  %vm253_vm13 = vcmp.gt.f32.partialorder %v1365_v59, 20.0 }
 0x15c   :  { %v242_v2 = vpop.f32.mrb[14].mxu0  ;;  %1038 = vlog2.f32 %v297_v63  ;;  %v301_v27 = vadd.f32 1.0, %v300_v13  ;;  %vm304_vm4 = vcmp.lt.f32.partialorder %v303_v31, 0.0004427343 }
 0x15d   :  { %v1029_v4 = vpop.eup %1028  ;;  %v275_v0 = vmul.f32 1.442695, %v261_v1  ;;  %v1370_v5 = vadd.f32 %v242_v2, %v127_v21  ;;  %v1372_v6 = vpop.f32.mrb[15].mxu0 }
 0x15e   :  { %v1031_v7 = vpop.eup %1030  ;;  %v306_v10 = vadd.f32 1.0, %v1029_v4  ;;  %v309_v30 = vmul.f32 -0.5, %v1029_v4  ;;  %v302_v41 = vmul.f32 %v1027_v57, %v301_v27  ;;  %v312_v46 = vand.u32 2147483647, %v1029_v4 }
 0x15f   :  { %1040 = vpow2.f32 %v275_v0  ;;  %v262_v11 = vmin.f32 %v1370_v5, 20.0  ;;  %v281_v12 = vmul.f32 0.6931472, %v1031_v7  ;;  %vm254_vm15 = vcmp.gt.f32.partialorder %v1370_v5, 20.0 }
 0x160   :  { %1042 = vlog2.f32 %v306_v10  ;;  %v310_v42 = vadd.f32 1.0, %v309_v30  ;;  %vm313_vm6 = vcmp.lt.f32.partialorder %v312_v46, 0.0004427343 }
 0x161   :  { %v1033_v15 = vpop.eup %1032  ;;  %v277_v16 = vmul.f32 1.442695, %v262_v11  ;;  %v287_v17 = vsel %vm286_vm0, %v284_v8, %v281_v12 }
 0x162   :  { %v1035_v19 = vpop.eup %1034  ;;  %v351_v21 = vsel %vm247_vm1, %v1335_v23, %v287_v17  ;;  %v315_v25 = vadd.f32 1.0, %v1033_v15  ;;  %v318_v43 = vmul.f32 -0.5, %v1033_v15  ;;  %v321_v57 = vand.u32 2147483647, %v1033_v15 }
 0x163   :  { %1044 = vpow2.f32 %v277_v16  ;;  %844 = vmatprep.mubr.f32.mxu1 %v351_v21  ;;  %v290_v26 = vmul.f32 0.6931472, %v1035_v19 }
 0x164   :  { %1046 = vlog2.f32 %v315_v25  ;;  %v319_v55 = vadd.f32 1.0, %v318_v43  ;;  %vm322_vm8 = vcmp.lt.f32.partialorder %v321_v57, 0.0004427343  ;;  %v606_v43 = vld [vmem:[#allocation8 + $0x38] sm:$0xff]  ;;  %v613_v57 = vld [vmem:[#allocation8 + $0x70] sm:$0xff] }
 0x165   :  { %v1037_v32 = vpop.eup %1036  ;;  %v296_v35 = vsel %vm295_vm2, %v293_v22, %v290_v26 }
 0x166   :  { %v1039_v36 = vpop.eup %1038  ;;  %v352_v37 = vsel %vm248_vm3, %v1340_v28, %v296_v35  ;;  %v324_v40 = vadd.f32 1.0, %v1037_v32  ;;  %v311_v28 = vmul.f32 %v1029_v4, %v310_v42  ;;  %v327_v56 = vmul.f32 -0.5, %v1037_v32  ;;  %v600_v35 = vld [vmem:[#allocation8 + $0x8] sm:$0xff] }
 0x167   :  { %845 = vmatmul.mubr.f32.vlgmr.msra.gmra.mrb[0].mxu1 %v352_v37  ;;  %v299_v23 = vmul.f32 0.6931472, %v1039_v36  ;;  %v330_v4 = vand.u32 2147483647, %v1037_v32  ;;  %v601_v37 = vld [vmem:[#allocation8 + $0x10] sm:$0xff] }
 0x168   :  { %1048 = vlog2.f32 %v324_v40  ;;  %v328_v3 = vadd.f32 1.0, %v327_v56  ;;  %v602_v40 = vld [vmem:[#allocation8 + $0x18] sm:$0xff] }
 0x169   :  { %v1041_v47 = vpop.eup %1040  ;;  %v305_v48 = vsel %vm304_vm4, %v302_v41, %v299_v23  ;;  %vm331_vm10 = vcmp.lt.f32.partialorder %v330_v4, 0.0004427343  ;;  %v603_v23 = vld [vmem:[#allocation8 + $0x20] sm:$0xff]  ;;  %v604_v41 = vld [vmem:[#allocation8 + $0x28] sm:$0xff] }
 0x16a   :  { %v1043_v49 = vpop.eup %1042  ;;  %v353_v50 = vsel %vm249_vm5, %v1345_v33, %v305_v48  ;;  %v333_v53 = vadd.f32 1.0, %v1041_v47  ;;  %v320_v33 = vmul.f32 %v1033_v15, %v319_v55  ;;  %v336_v0 = vmul.f32 -0.5, %v1041_v47  ;;  %v608_v48 = vld [vmem:[#allocation8 + $0x48] sm:$0xff] }
 0x16b   :  { %847 = vmatprep.mubr.f32.mxu1 %v353_v50  ;;  %v308_v54 = vmul.f32 0.6931472, %v1043_v49  ;;  %v329_v11 = vmul.f32 %v1037_v32, %v328_v3  ;;  %v339_v13 = vand.u32 2147483647, %v1041_v47  ;;  %v599_v32 = vld [vmem:[#allocation8] sm:$0xff]  ;;  %v972_v42 = vpack.c.bf16 %v604_v41, %v603_v23  ;;  %v609_v50 = vld [vmem:[#allocation8 + $0x50] sm:$0xff] }
 0x16c   :  { %1050 = vlog2.f32 %v333_v53  ;;  %v337_v12 = vadd.f32 1.0, %v336_v0  ;;  %v964_v36 = vpack.c.bf16 %v600_v35, %v599_v32  ;;  %v610_v53 = vld [vmem:[#allocation8 + $0x58] sm:$0xff]  ;;  %v612_v55 = vld [vmem:[#allocation8 + $0x68] sm:$0xff] }
 0x16d   :  { %v1045_v58 = vpop.eup %1044  ;;  %v314_v61 = vsel %vm313_vm6, %v311_v28, %v308_v54  ;;  %vm340_vm12 = vcmp.lt.f32.partialorder %v339_v13, 0.0004427343  ;;  %v984_v54 = vpack.c.bf16 %v610_v53, %v609_v50  ;;  %v611_v28 = vld [vmem:[#allocation8 + $0x60] sm:$0xff] }
 0x16e   :  { %v1047_v62 = vpop.eup %1046  ;;  %v354_v63 = vsel %vm250_vm7, %v1350_v38, %v314_v61  ;;  %v342_v1 = vadd.f32 1.0, %v1045_v58  ;;  %v345_v38 = vmul.f32 -0.5, %v1045_v58  ;;  %v338_v19 = vmul.f32 %v1041_v47, %v337_v12  ;;  %965 = vmatprep.subr.bf16.mxu0 %v964_v36  ;;  %996 = vmatprep.subr.bf16.mxu1 %v964_v36  ;;  %v607_v47 = vld [vmem:[#allocation8 + $0x40] sm:$0xff] }
 0x16f   :  { %848 = vmatmul.mubr.f32.gmra.mrb[2].mxu1 %v354_v63  ;;  %v317_v2 = vmul.f32 0.6931472, %v1047_v62  ;;  %v348_v22 = vand.u32 2147483647, %v1045_v58  ;;  %967 = vmatpush3.bf16.msra.mxu0 %v964_v36  ;;  %v980_v49 = vpack.c.bf16 %v608_v48, %v607_v47  ;;  %v988_v56 = vpack.c.bf16 %v612_v55, %v611_v28  ;;  %v762_v62 = vld [vmem:[%s1478_s4] ss:$0 sm:$0xff] }
 0x170   :  { %1052 = vlog2.f32 %v342_v1  ;;  %v346_v21 = vadd.f32 1.0, %v345_v38  ;;  %1004 = vmatpush3.bf16.msra.mxu1 %v964_v36 }
 0x171   :  { %v323_v7 = vsel %vm322_vm8, %v320_v33, %v317_v2  ;;  %vm349_vm14 = vcmp.lt.f32.partialorder %v348_v22, 0.0004427343 }
 0x172   :  { %v1049_v8 = vpop.eup %1048  ;;  %v355_v9 = vsel %vm251_vm9, %v1355_v44, %v323_v7  ;;  %v347_v30 = vmul.f32 %v1045_v58, %v346_v21  ;;  %v614_v58 = vld [vmem:[#allocation8 + $0x78] sm:$0xff] }
 0x173   :  { %850 = vmatprep.mubr.f32.mxu1 %v355_v9  ;;  %v326_v10 = vmul.f32 0.6931472, %v1049_v8  ;;  %v992_v61 = vpack.c.bf16 %v614_v58, %v613_v57 }
 0x175   :  { %v332_v14 = vsel %vm331_vm10, %v329_v11, %v326_v10 }
 0x176   :  { %v1051_v15 = vpop.eup %1050  ;;  %v356_v16 = vsel %vm252_vm11, %v1360_v51, %v332_v14 }
 0x177   :  { %851 = vmatmul.mubr.f32.gmra.mrb[4].mxu1 %v356_v16  ;;  %v335_v17 = vmul.f32 0.6931472, %v1051_v15 }
 0x179   :  { %v341_v44 = vsel %vm340_vm12, %v338_v19, %v335_v17 }
 0x17a   :  { %v1053_v25 = vpop.eup %1052  ;;  %v357_v26 = vsel %vm253_vm13, %v1365_v59, %v341_v44  ;;  %v968_v59 = vpack.c.bf16 %v602_v40, %v601_v37 }
 0x17b   :  { %853 = vmatprep.mubr.f32.mxu1 %v357_v26  ;;  %v344_v27 = vmul.f32 0.6931472, %v1053_v25 }
 0x17c   :  { %969 = vmatprep.subr.bf16.mxu0 %v968_v59  ;;  %997 = vmatprep.subr.bf16.mxu1 %v968_v59 }
 0x17d   :  { %v350_v31 = vsel %vm349_vm14, %v347_v30, %v344_v27  ;;  %971 = vmatpush3.bf16.msra.mxu0 %v968_v59  ;;  %1005 = vmatpush3.bf16.msra.mxu1 %v968_v59 }
 0x17e   :  { %v358_v51 = vsel %vm254_vm15, %v1370_v5, %v350_v31  ;;  %973 = vmatprep.subr.bf16.mxu0 %v972_v42  ;;  %998 = vmatprep.subr.bf16.mxu1 %v972_v42  ;;  %v605_v5 = vld [vmem:[#allocation8 + $0x30] sm:$0xff] }
 0x17f   :  { %854 = vmatmul.mubr.f32.gmra.mrb[6].mxu1 %v358_v51  ;;  %v976_v46 = vpack.c.bf16 %v606_v43, %v605_v5 }
 0x181   :  { %975 = vmatpush3.bf16.msra.mxu0 %v972_v42  ;;  %1006 = vmatpush3.bf16.msra.mxu1 %v972_v42 }
 0x182   :  { %977 = vmatprep.subr.bf16.mxu0 %v976_v46  ;;  %999 = vmatprep.subr.bf16.mxu1 %v976_v46 }
 0x185   :  { %979 = vmatpush3.bf16.msra.mxu0 %v976_v46  ;;  %1007 = vmatpush3.bf16.msra.mxu1 %v976_v46 }
 0x186   :  { %981 = vmatprep.subr.bf16.mxu0 %v980_v49  ;;  %1000 = vmatprep.subr.bf16.mxu1 %v980_v49 }
 0x189   :  { %983 = vmatpush3.bf16.msra.mxu0 %v980_v49  ;;  %1008 = vmatpush3.bf16.msra.mxu1 %v980_v49 }
 0x18a   :  { %985 = vmatprep.subr.bf16.mxu0 %v984_v54  ;;  %1001 = vmatprep.subr.bf16.mxu1 %v984_v54 }
 0x18d   :  { %987 = vmatpush3.bf16.msra.mxu0 %v984_v54  ;;  %1009 = vmatpush3.bf16.msra.mxu1 %v984_v54 }
 0x18e   :  { %989 = vmatprep.subr.bf16.mxu0 %v988_v56  ;;  %1002 = vmatprep.subr.bf16.mxu1 %v988_v56 }
 0x191   :  { %991 = vmatpush3.bf16.msra.mxu0 %v988_v56  ;;  %1010 = vmatpush3.bf16.msra.mxu1 %v988_v56 }
 0x192   :  { %993 = vmatprep.subr.bf16.mxu0 %v992_v61  ;;  %1003 = vmatprep.subr.bf16.mxu1 %v992_v61 }
 0x195   :  { %995 = vmatpush3.bf16.msra.mxu0 %v992_v61  ;;  %1011 = vmatpush3.bf16.msra.mxu1 %v992_v61 }
 0x23a   :  { %v846_v63 = vpop.f32.mrb[0].mxu1 }
 0x23b   :  { %v1394_v1 = vadd.f32 %v846_v63, %v762_v62  ;;  %v448_v2 = vpop.f32.mrb[1].mxu1 }
 0x23c   :  { %v1396_v33 = vadd.f32 %v762_v62, %v448_v2 }
 0x23d   :  { %v496_v3 = vmin.f32 %v1394_v1, 20.0  ;;  %vm488_vm1 = vcmp.gt.f32.partialorder %v1394_v1, 20.0 }
 0x23e   :  { %v495_v0 = vmin.f32 %v1396_v33, 20.0  ;;  %vm487_vm3 = vcmp.gt.f32.partialorder %v1396_v33, 20.0 }
 0x23f   :  { %v505_v4 = vmul.f32 1.442695, %v496_v3 }
 0x240   :  { %v503_v7 = vmul.f32 1.442695, %v495_v0 }
 0x241   :  { %1054 = vpow2.f32 %v505_v4 }
 0x242   :  { %1056 = vpow2.f32 %v503_v7  ;;  %v849_v8 = vpop.f32.mrb[2].mxu1 }
 0x243   :  { %v1400_v9 = vadd.f32 %v849_v8, %v762_v62  ;;  %v458_v10 = vpop.f32.mrb[3].mxu1 }
 0x244   :  { %v1402_v11 = vadd.f32 %v762_v62, %v458_v10 }
 0x245   :  { %v498_v12 = vmin.f32 %v1400_v9, 20.0  ;;  %vm490_vm7 = vcmp.gt.f32.partialorder %v1400_v9, 20.0 }
 0x246   :  { %v497_v38 = vmin.f32 %v1402_v11, 20.0  ;;  %vm489_vm6 = vcmp.gt.f32.partialorder %v1402_v11, 20.0 }
 0x247   :  { %v509_v13 = vmul.f32 1.442695, %v498_v12 }
 0x248   :  { %v507_v14 = vmul.f32 1.442695, %v497_v38 }
 0x249   :  { %1058 = vpow2.f32 %v509_v13 }
 0x24a   :  { %1060 = vpow2.f32 %v507_v14  ;;  %v852_v15 = vpop.f32.mrb[4].mxu1 }
 0x24b   :  { %v1055_v16 = vpop.eup %1054  ;;  %v1406_v17 = vadd.f32 %v852_v15, %v762_v62  ;;  %v468_v19 = vpop.f32.mrb[5].mxu1 }
 0x24c   :  { %v1057_v21 = vpop.eup %1056  ;;  %v528_v22 = vadd.f32 1.0, %v1055_v16  ;;  %v1408_v44 = vadd.f32 %v762_v62, %v468_v19  ;;  %v531_v51 = vmul.f32 -0.5, %v1055_v16  ;;  %v534_v47 = vand.u32 2147483647, %v1055_v16 }
 0x24d   :  { %v500_v25 = vmin.f32 %v1406_v17, 20.0  ;;  %v519_v26 = vadd.f32 1.0, %v1057_v21  ;;  %v522_v40 = vmul.f32 -0.5, %v1057_v21  ;;  %v525_v54 = vand.u32 2147483647, %v1057_v21 }
 0x24e   :  { %1062 = vlog2.f32 %v528_v22  ;;  %v499_v27 = vmin.f32 %v1408_v44, 20.0  ;;  %v532_v43 = vadd.f32 1.0, %v531_v51  ;;  %vm1418_vm0 = vcmp.lt.f32.partialorder %v534_v47, 0.0004427343 }
 0x24f   :  { %v513_v30 = vmul.f32 1.442695, %v500_v25  ;;  %1064 = vlog2.f32 %v519_v26  ;;  %v523_v49 = vadd.f32 1.0, %v522_v40  ;;  %vm526_vm2 = vcmp.lt.f32.partialorder %v525_v54, 0.0004427343 }
 0x250   :  { %v511_v31 = vmul.f32 1.442695, %v499_v27  ;;  %v533_v57 = vmul.f32 %v1055_v16, %v532_v43  ;;  %vm491_vm10 = vcmp.gt.f32.partialorder %v1408_v44, 20.0  ;;  %vm492_vm11 = vcmp.gt.f32.partialorder %v1406_v17, 20.0 }
 0x251   :  { %1066 = vpow2.f32 %v513_v30  ;;  %v524_v2 = vmul.f32 %v1057_v21, %v523_v49 }
 0x252   :  { %1068 = vpow2.f32 %v511_v31  ;;  %v855_v32 = vpop.f32.mrb[6].mxu1 }
 0x253   :  { %v1059_v35 = vpop.eup %1058  ;;  %v1412_v36 = vadd.f32 %v855_v32, %v762_v62  ;;  %v478_v37 = vpop.f32.mrb[7].mxu1 }
 0x254   :  { %v1061_v59 = vpop.eup %1060  ;;  %v1414_v23 = vadd.f32 %v762_v62, %v478_v37  ;;  %v546_v41 = vadd.f32 1.0, %v1059_v35  ;;  %v549_v56 = vmul.f32 -0.5, %v1059_v35  ;;  %v552_v13 = vand.u32 2147483647, %v1059_v35 }
 0x255   :  { %v502_v42 = vmin.f32 %v1412_v36, 20.0  ;;  %v537_v5 = vadd.f32 1.0, %v1061_v59  ;;  %v540_v61 = vmul.f32 -0.5, %v1061_v59  ;;  %v543_v15 = vand.u32 2147483647, %v1061_v59 }
 0x256   :  { %v501_v46 = vmin.f32 %v1414_v23, 20.0  ;;  %1070 = vlog2.f32 %v546_v41  ;;  %v550_v8 = vadd.f32 1.0, %v549_v56  ;;  %vm1428_vm4 = vcmp.lt.f32.partialorder %v552_v13, 0.0004427343  ;;  %v763_v13 = vld [vmem:[%s1480_s6] ss:$0 sm:$0xff] }
 0x257   :  { %v517_v48 = vmul.f32 1.442695, %v502_v42  ;;  %1072 = vlog2.f32 %v537_v5  ;;  %v541_v38 = vadd.f32 1.0, %v540_v61  ;;  %vm544_vm5 = vcmp.lt.f32.partialorder %v543_v15, 0.0004427343  ;;  %s1213_s6 = smov [#allocation10]  }
 0x258   :  { %v1063_v50 = vpop.eup %1062  ;;  %v515_v53 = vmul.f32 1.442695, %v501_v46  ;;  %v551_v25 = vmul.f32 %v1059_v35, %v550_v8  ;;  %vm493_vm14 = vcmp.gt.f32.partialorder %v1414_v23, 20.0  ;;  %vm494_vm15 = vcmp.gt.f32.partialorder %v1412_v36, 20.0  ;;  %s748_s8 = sshll.u32 %s1213_s6, 4  ;;  %s749_s8 = int_to_ptr.vmem [resolvable:$true] %s748_s8 }
 0x259   :  { %v1065_v28 = vpop.eup %1064  ;;  %v530_v55 = vmul.f32 0.6931472, %v1063_v50  ;;  %1074 = vpow2.f32 %v517_v48  ;;  %v542_v27 = vmul.f32 %v1061_v59, %v541_v38  ;;  %s1174_s9 = scalar_lea.vmem %s749_s8, 1024  ;;  %p1179_p5 = scmp.lt.s32.totalorder %s749_s8, %s749_s8 }
 0x25a   :  { %1076 = vpow2.f32 %v515_v53  ;;  %v521_v58 = vmul.f32 0.6931472, %v1065_v28  ;;  %p1175_p4 = scmp.ne.s32.totalorder %s749_s8, %s1174_s9  ;;  %p1180_p6 = scmp.lt.s32.totalorder %s1174_s9, %s1174_s9 }
 0x25b   :  { %v1067_v62 = vpop.eup %1066  ;;  %v536_v0 = vsel %vm1418_vm0, %v533_v57, %v530_v55 }
 0x25c   :  { %v1069_v3 = vpop.eup %1068  ;;  %v564_v4 = vadd.f32 1.0, %v1067_v62  ;;  %v527_v7 = vsel %vm526_vm2, %v524_v2, %v521_v58  ;;  %v592_v14 = vsel %vm488_vm1, %v1394_v1, %v536_v0  ;;  %v567_v21 = vmul.f32 -0.5, %v1067_v62  ;;  %p1181_p7 = por %p1180_p6, %p1179_p5 }
 0x25d   :  { %v555_v10 = vadd.f32 1.0, %v1069_v3  ;;  %v591_v12 = vsel %vm487_vm3, %v1396_v33, %v527_v7  ;;  %v558_v33 = vmul.f32 -0.5, %v1069_v3  ;;  %v570_v41 = vand.u32 2147483647, %v1067_v62 }
 0x25e   :  { %1078 = vlog2.f32 %v564_v4  ;;  %888 = vmatprep.mubr.f32.mxu0 %v591_v12  ;;  %v568_v40 = vadd.f32 1.0, %v567_v21  ;;  %v561_v43 = vand.u32 2147483647, %v1069_v3  ;;  %v130_v12 = vsub.s32 1, %v1326_v18  ;;  %p1182_p8 = pnand %p1181_p7, %p1175_p4 }
 0x25f   :  { %1080 = vlog2.f32 %v555_v10  ;;  %889 = vmatmul.mubr.f32.vlgmr.msra.gmra.mrb[16].mxu0 %v592_v14  ;;  %v559_v5 = vadd.f32 1.0, %v558_v33  ;;  %vm571_vm8 = vcmp.lt.f32.partialorder %v570_v41, 0.0004427343 }
 0x260   :  { %v1071_v16 = vpop.eup %1070  ;;  %v569_v49 = vmul.f32 %v1067_v62, %v568_v40  ;;  %vm562_vm9 = vcmp.lt.f32.partialorder %v561_v43, 0.0004427343  ;;  %v131_v38 = vrot.slane %v1332_v20, %v130_v12 }
 0x261   :  { %v1073_v19 = vpop.eup %1072  ;;  %v548_v22 = vmul.f32 0.6931472, %v1071_v16 }
 0x262   :  { %v539_v26 = vmul.f32 0.6931472, %v1073_v19  ;;  %v209_v15 = vadd.f32 %v1342_v29, %v131_v38  ;;  %v221_v18 = vadd.f32 %v1352_v39, %v131_v38 }
 0x263   :  { %v1075_v31 = vpop.eup %1074  ;;  %v554_v1 = vsel %vm1428_vm4, %v551_v25, %v548_v22 }
 0x264   :  { %v1077_v51 = vpop.eup %1076  ;;  %v545_v32 = vsel %vm544_vm5, %v542_v27, %v539_v26  ;;  %v582_v37 = vadd.f32 1.0, %v1075_v31  ;;  %v594_v42 = vsel %vm490_vm7, %v1400_v9, %v554_v1  ;;  %v585_v50 = vmul.f32 -0.5, %v1075_v31 }
 0x265   :  { %v593_v35 = vsel %vm489_vm6, %v1402_v11, %v545_v32  ;;  %v573_v59 = vadd.f32 1.0, %v1077_v51  ;;  %v560_v11 = vmul.f32 %v1069_v3, %v559_v5  ;;  %v576_v54 = vmul.f32 -0.5, %v1077_v51 }
 0x266   :  { %891 = vmatprep.mubr.f32.mxu0 %v593_v35  ;;  %1082 = vlog2.f32 %v582_v37  ;;  %v586_v56 = vadd.f32 1.0, %v585_v50  ;;  %v588_v61 = vand.u32 2147483647, %v1075_v31  ;;  %v579_v62 = vand.u32 2147483647, %v1077_v51 }
 0x267   :  { %892 = vmatmul.mubr.f32.gmra.mrb[18].mxu0 %v594_v42  ;;  %1084 = vlog2.f32 %v573_v59  ;;  %v577_v58 = vadd.f32 1.0, %v576_v54  ;;  %v215_v27 = vadd.f32 %v1347_v34, %v131_v38  ;;  %v227_v32 = vadd.f32 %v1357_v45, %v131_v38 }
 0x268   :  { %v1079_v46 = vpop.eup %1078  ;;  %v587_v0 = vmul.f32 %v1075_v31, %v586_v56  ;;  %vm589_vm12 = vcmp.lt.f32.partialorder %v588_v61, 0.0004427343  ;;  %vm580_vm13 = vcmp.lt.f32.partialorder %v579_v62, 0.0004427343  ;;  %v245_v34 = vadd.f32 %v1372_v6, %v131_v38 }
 0x269   :  { %v1081_v47 = vpop.eup %1080  ;;  %v566_v48 = vmul.f32 0.6931472, %v1079_v46  ;;  %v578_v7 = vmul.f32 %v1077_v51, %v577_v58  ;;  %v239_v42 = vadd.f32 %v1367_v60, %v131_v38 }
 0x26a   :  { %v557_v53 = vmul.f32 0.6931472, %v1081_v47 }
 0x26b   :  { %v572_v28 = vsel %vm571_vm8, %v569_v49, %v566_v48 }
 0x26c   :  { %v563_v55 = vsel %vm562_vm9, %v560_v11, %v557_v53  ;;  %v596_v57 = vsel %vm492_vm11, %v1406_v17, %v572_v28 }
 0x26d   :  { %v595_v9 = vsel %vm491_vm10, %v1408_v44, %v563_v55 }
 0x26e   :  { %894 = vmatprep.mubr.f32.mxu1 %v595_v9 }
 0x26f   :  { %895 = vmatmul.mubr.f32.vlgmr.msra.gmra.mrb[8].mxu1 %v596_v57 }
 0x270   :  { %v1083_v63 = vpop.eup %1082 }
 0x271   :  { %v1085_v2 = vpop.eup %1084  ;;  %v584_v3 = vmul.f32 0.6931472, %v1083_v63 }
 0x272   :  { %v575_v4 = vmul.f32 0.6931472, %v1085_v2 }
 0x273   :  { %v590_v8 = vsel %vm589_vm12, %v587_v0, %v584_v3 }
 0x274   :  { %v581_v44 = vsel %vm580_vm13, %v578_v7, %v575_v4  ;;  %v598_v17 = vsel %vm494_vm15, %v1412_v36, %v590_v8 }
 0x275   :  { %v597_v10 = vsel %vm493_vm14, %v1414_v23, %v581_v44  ;;  %v203_v23 = vadd.f32 %v1337_v24, %v131_v38  ;;  %v233_v24 = vadd.f32 %v1362_v52, %v131_v38 }
 0x276   :  { %897 = vmatprep.mubr.f32.mxu1 %v597_v10 }
 0x277   :  { %898 = vmatmul.mubr.f32.gmra.mrb[10].mxu1 %v598_v17 }
 0x332   :  { %v890_v14 = vpop.f32.mrb[16].mxu0 }
 0x333   :  { %v694_v16 = vadd.f32 %v890_v14, %v763_v13  ;;  %v688_v19 = vpop.f32.mrb[17].mxu0 }
 0x334   :  { %v689_v21 = vadd.f32 %v763_v13, %v688_v19 }
 0x335   :  { %v728_v22 = vadd.f32 %v694_v16, %v209_v15 }
 0x336   :  { %v727_v25 = vadd.f32 %v689_v21, %v203_v23 }
 0x337   :  { %736 = vst [vmem:[#allocation10 + $0x8] sm:$0xff] %v728_v22 }
 0x338   :  { %735 = vst [vmem:[#allocation10] sm:$0xff] %v727_v25 }
 0x33a   :  { %v893_v36 = vpop.f32.mrb[18].mxu0 }
 0x33b   :  { %v704_v20 = vadd.f32 %v893_v36, %v763_v13  ;;  %v698_v26 = vpop.f32.mrb[19].mxu0 }
 0x33c   :  { %v699_v30 = vadd.f32 %v763_v13, %v698_v26 }
 0x33d   :  { %v730_v33 = vadd.f32 %v704_v20, %v221_v18 }
 0x33e   :  { %v729_v31 = vadd.f32 %v699_v30, %v215_v27 }
 0x33f   :  { %738 = vst [vmem:[#allocation10 + $0x18] sm:$0xff] %v730_v33 }
 0x340   :  { %737 = vst [vmem:[#allocation10 + $0x10] sm:$0xff] %v729_v31 }
 0x342   :  { %v896_v29 = vpop.f32.mrb[8].mxu1 }
 0x343   :  { %v714_v1 = vadd.f32 %v896_v29, %v763_v13  ;;  %v708_v51 = vpop.f32.mrb[9].mxu1 }
 0x344   :  { %v709_v37 = vadd.f32 %v763_v13, %v708_v51 }
 0x345   :  { %v732_v40 = vadd.f32 %v714_v1, %v233_v24 }
 0x346   :  { %v731_v35 = vadd.f32 %v709_v37, %v227_v32 }
 0x347   :  { %740 = vst [vmem:[#allocation10 + $0x28] sm:$0xff] %v732_v40 }
 0x348   :  { %739 = vst [vmem:[#allocation10 + $0x20] sm:$0xff] %v731_v35 }
 0x34a   :  { %v899_v39 = vpop.f32.mrb[10].mxu1 }
 0x34b   :  { %v724_v59 = vadd.f32 %v899_v39, %v763_v13  ;;  %v718_v41 = vpop.f32.mrb[11].mxu1 }
 0x34c   :  { %v719_v5 = vadd.f32 %v763_v13, %v718_v41 }
 0x34d   :  { %v734_v52 = vadd.f32 %v724_v59, %v245_v34 }
 0x34e   :  { %v733_v43 = vadd.f32 %v719_v5, %v239_v42 }
 0x34f   :  { %742 = vst [vmem:[#allocation10 + $0x38] sm:$0xff] %v734_v52 }
 0x350   :  { %741 = vst [vmem:[#allocation10 + $0x30] sm:$0xff] %v733_v43 }
 0x351   :  { %1185 = shalt.err (!%p1182_p8)
}
 0x352   :  { %s1186_s12 = scalar_lea.hbm %s1481_s7, 1024 }
 0x353   :  { %p1187_p9 = scmp.ne.s32.totalorder %s1481_s7, %s1186_s12  ;;  %p1190_p10 = scmp.lt.u32.totalorder %s1186_s12, %s1481_s7 }
 0x355   :  { %p1192_p11 = pnand %p1190_p10, %p1187_p9 }
 0x357   :  { %1195 = shalt.err (!%p1192_p11)
}
 0x358   :  { %754 = dma.vmem_to_hbm [thread:$0]  %s749_s8, 1024, %s1481_s7, [#allocation4], %s1208_s1, %s1208_s1, %s1209_s25  }
 0x359   :  { %1202 = dma.done.wait [#allocation4], 1024  }
 0x35a   :  { %1203 = vsyncadd [#allocation4], 4294966272 }
 0x35b   :  { %758 = vsyncpa [#allocation3], 1 }
 0x35c   :  { %759 = vsyncpa [#allocation6], 1 }
 0x35d   :  { %760 = vsyncpa [#allocation9], 1 }
 0x35e   :  { %761 = vsyncpa [#allocation4], 1 }

// kernel: tpu_custom_call.1
= control target key start
LH: loop header
LB: loop body
LE: loop exit
PB: predicated region body
PF: predicated region fallthrough
CT: control target
= control target key end

     0   :  { %12 = vsyncpa [#allocation3], 0  ;;  %s1474_s0 = inlined_call_operand.hbm [shape: f32[64,128], index: 0, kind: input, shape index: {}]   ;;  %s1475_s1 = inlined_call_operand.hbm [shape: f32[128,256], index: 1, kind: input, shape index: {}]   ;;  %s1476_s2 = inlined_call_operand.vmem [shape: f32[1,256], index: 2, kind: input, shape index: {}]   ;;  %s1477_s3 = inlined_call_operand.hbm [shape: f32[128,128], index: 3, kind: input, shape index: {}]   ;;  %s1478_s4 = inlined_call_operand.vmem [shape: f32[1,128], index: 4, kind: input, shape index: {}]   ;;  %s1479_s5 = inlined_call_operand.hbm [shape: f32[128,128], index: 5, kind: input, shape index: {}]   ;;  %s1480_s6 = inlined_call_operand.vmem [shape: f32[1,128], index: 6, kind: input, shape index: {}]   ;;  %s1481_s7 = inlined_call_operand.hbm [shape: f32[64,128], index: 7, kind: output, shape index: {}]  }
   0x1   :  { %13 = vsyncpa [#allocation6], 0 }
   0x2   :  { %14 = vsyncpa [#allocation9], 0 }
   0x3   :  { %15 = vsyncpa [#allocation4], 0  ;;  %s1204_s24 = smov [#allocation5]   ;;  %s1086_s28 = scalar_lea.hbm %s1475_s1, 4096 }
   0x4   :  { %s33_s25 = sshll.u32 %s1204_s24, 4  ;;  %p1087_p0 = scmp.ne.s32.totalorder %s1475_s1, %s1086_s28  ;;  %s34_s25 = int_to_ptr.vmem [resolvable:$true] %s33_s25 }
   0x5   :  { %p1090_p1 = scmp.lt.u32.totalorder %s1086_s28, %s1475_s1 }
   0x7   :  { %p1092_p2 = pnand %p1090_p1, %p1087_p0 }
   0x9   :  { %1095 = shalt.err (!%p1092_p2)
}
   0xa   :  { %s1096_s10 = scalar_lea.vmem %s34_s25, 4096  ;;  %p1101_p4 = scmp.lt.s32.totalorder %s34_s25, %s34_s25 }
   0xb   :  { %p1097_p3 = scmp.ne.s32.totalorder %s34_s25, %s1096_s10  ;;  %p1102_p5 = scmp.lt.s32.totalorder %s1096_s10, %s1096_s10 }
   0xd   :  { %p1103_p6 = por %p1102_p5, %p1101_p4 }
   0xf   :  { %p1104_p7 = pnand %p1103_p6, %p1097_p3 }
  0x11   :  { %1107 = shalt.err (!%p1104_p7)
}
  0x12   :  { %s1205_s11 = smov 256   ;;  %s1206_s12 = smov 16  }
  0x13   :  { %39 = dma.hbm_to_vmem [thread:$0]  %s1475_s1, 4096, %s34_s25, [#allocation6], %s1205_s11, %s1205_s11, %s1206_s12  }
  0x14   :  { %s1207_s15 = smov [#allocation2]   ;;  %s1108_s19 = scalar_lea.hbm %s1474_s0, 1024 }
  0x15   :  { %s21_s16 = sshll.u32 %s1207_s15, 4  ;;  %p1109_p8 = scmp.ne.s32.totalorder %s1474_s0, %s1108_s19  ;;  %s22_s16 = int_to_ptr.vmem [resolvable:$true] %s21_s16 }
  0x16   :  { %p1112_p9 = scmp.lt.u32.totalorder %s1108_s19, %s1474_s0 }
  0x18   :  { %p1114_p10 = pnand %p1112_p9, %p1109_p8 }
  0x1a   :  { %1117 = shalt.err (!%p1114_p10)
}
  0x1b   :  { %s1118_s24 = scalar_lea.vmem %s22_s16, 1024  ;;  %p1123_p12 = scmp.lt.s32.totalorder %s22_s16, %s22_s16 }
  0x1c   :  { %p1119_p11 = scmp.ne.s32.totalorder %s22_s16, %s1118_s24  ;;  %p1124_p13 = scmp.lt.s32.totalorder %s1118_s24, %s1118_s24 }
  0x1e   :  { %p1125_p0 = por %p1124_p13, %p1123_p12 }
  0x20   :  { %p1126_p1 = pnand %p1125_p0, %p1119_p11 }
  0x22   :  { %1129 = shalt.err (!%p1126_p1)
}
  0x23   :  { %s1208_s1 = smov 128   ;;  %s1209_s25 = smov 8  }
  0x24   :  { %27 = dma.hbm_to_vmem [thread:$0]  %s1474_s0, 1024, %s22_s16, [#allocation3], %s1208_s1, %s1208_s1, %s1209_s25  }
  0x25   :  { %s1210_s28 = smov [#allocation7]   ;;  %s1211_s30 = smov [#allocation8]  }
  0x26   :  { %s47_s29 = sshll.u32 %s1210_s28, 4  ;;  %s61_s8 = sshll.u32 %s1211_s30, 4  ;;  %s48_s29 = int_to_ptr.vmem [resolvable:$true] %s47_s29  ;;  %s1281_s8 = int_to_ptr.vmem [resolvable:$true] %s61_s8 }
  0x27   :  { %s1130_s11 = scalar_lea.hbm %s1477_s3, 2048 }
  0x28   :  { %p1131_p2 = scmp.ne.s32.totalorder %s1477_s3, %s1130_s11  ;;  %p1134_p3 = scmp.lt.u32.totalorder %s1130_s11, %s1477_s3 }
  0x2a   :  { %p1136_p4 = pnand %p1134_p3, %p1131_p2 }
  0x2c   :  { %1139 = shalt.err (!%p1136_p4)
}
  0x2d   :  { %s1140_s0 = scalar_lea.vmem %s48_s29, 2048  ;;  %p1145_p6 = scmp.lt.s32.totalorder %s48_s29, %s48_s29 }
  0x2e   :  { %p1141_p5 = scmp.ne.s32.totalorder %s48_s29, %s1140_s0  ;;  %p1146_p7 = scmp.lt.s32.totalorder %s1140_s0, %s1140_s0 }
  0x30   :  { %p1147_p8 = por %p1146_p7, %p1145_p6 }
  0x32   :  { %p1148_p9 = pnand %p1147_p8, %p1141_p5 }
  0x34   :  { %1151 = shalt.err (!%p1148_p9)
}
  0x35   :  { %53 = dma.hbm_to_vmem [thread:$0]  %s1477_s3, 2048, %s48_s29, [#allocation6], %s1208_s1, %s1208_s1, %s1209_s25  }
  0x36   :  { %s1152_s20 = scalar_lea.hbm %s1479_s5, 2048 }
  0x37   :  { %p1153_p10 = scmp.ne.s32.totalorder %s1479_s5, %s1152_s20  ;;  %p1156_p11 = scmp.lt.u32.totalorder %s1152_s20, %s1479_s5 }
  0x39   :  { %p1158_p12 = pnand %p1156_p11, %p1153_p10 }
  0x3b   :  { %1161 = shalt.err (!%p1158_p12)
}
  0x3c   :  { %s1162_s26 = scalar_lea.vmem %s1281_s8, 2048  ;;  %p1167_p0 = scmp.lt.s32.totalorder %s1281_s8, %s1281_s8 }
  0x3d   :  { %p1163_p13 = scmp.ne.s32.totalorder %s1281_s8, %s1162_s26  ;;  %p1168_p1 = scmp.lt.s32.totalorder %s1162_s26, %s1162_s26 }
  0x3f   :  { %p1169_p2 = por %p1168_p1, %p1167_p0 }
  0x41   :  { %p1170_p3 = pnand %p1169_p2, %p1163_p13 }
  0x43   :  { %1173 = shalt.err (!%p1170_p3)
}
  0x44   :  { %67 = dma.hbm_to_vmem [thread:$0]  %s1479_s5, 2048, %s1281_s8, [#allocation9], %s1208_s1, %s1208_s1, %s1209_s25  }
  0x45   :  { %1196 = dma.done.wait [#allocation3], 1024  }
  0x46   :  { %1197 = vsyncadd [#allocation3], 4294966272 }
  0x47   :  { %1198 = dma.done.wait [#allocation6], 6144  }
  0x48   :  { %1199 = vsyncadd [#allocation6], 4294961152 }
  0x49   :  { %1200 = dma.done.wait [#allocation9], 2048  }
  0x4a   :  { %1201 = vsyncadd [#allocation9], 4294965248  ;;  %v1212_v0 = vmov 0.0   ;;  %v91_v1 = vld [vmem:[#allocation5 + $0x8] sm:$0xff]  ;;  %v93_v2 = vld [vmem:[#allocation5 + $0x18] sm:$0xff] }
  0x4b   :  { %198 = vmatprep.mubr.f32.mxu0 %v1212_v0  ;;  %v90_v3 = vld [vmem:[#allocation5] sm:$0xff]  ;;  %v900_v4 = vpack.c.bf16 %v93_v2, %v91_v1  ;;  %v92_v5 = vld [vmem:[#allocation5 + $0x10] sm:$0xff]  ;;  %v95_v6 = vld [vmem:[#allocation5 + $0x28] sm:$0xff] }
  0x4c   :  { %v97_v7 = vld [vmem:[#allocation5 + $0x38] sm:$0xff]  ;;  %v902_v8 = vpack.c.bf16 %v92_v5, %v90_v3  ;;  %v94_v10 = vld [vmem:[#allocation5 + $0x20] sm:$0xff]  ;;  %v96_v11 = vld [vmem:[#allocation5 + $0x30] sm:$0xff] }
  0x4d   :  { %v904_v9 = vpack.c.bf16 %v97_v7, %v95_v6  ;;  %v99_v12 = vld [vmem:[#allocation5 + $0x48] sm:$0xff]  ;;  %901 = vmatprep.subr.bf16.mxu0 %v900_v4  ;;  %v101_v13 = vld [vmem:[#allocation5 + $0x58] sm:$0xff]  ;;  %v906_v14 = vpack.c.bf16 %v96_v11, %v94_v10  ;;  %v98_v16 = vld [vmem:[#allocation5 + $0x40] sm:$0xff] }
  0x4e   :  { %903 = vmatpush1.bf16.msra.mxu0 %v902_v8  ;;  %v908_v15 = vpack.c.bf16 %v101_v13, %v99_v12  ;;  %v100_v17 = vld [vmem:[#allocation5 + $0x50] sm:$0xff]  ;;  %v103_v18 = vld [vmem:[#allocation5 + $0x68] sm:$0xff]  ;;  %v105_v19 = vld [vmem:[#allocation5 + $0x78] sm:$0xff] }
  0x4f   :  { %905 = vmatprep.subr.bf16.mxu0 %v904_v9  ;;  %v910_v20 = vpack.c.bf16 %v100_v17, %v98_v16  ;;  %v912_v21 = vpack.c.bf16 %v105_v19, %v103_v18  ;;  %v102_v22 = vld [vmem:[#allocation5 + $0x60] sm:$0xff]  ;;  %v104_v23 = vld [vmem:[#allocation5 + $0x70] sm:$0xff]  ;;  %v107_v24 = vld [vmem:[#allocation5 + $0x88] sm:$0xff]  ;;  %v124_v17 = vlaneseq }
  0x50   :  { %v109_v25 = vld [vmem:[#allocation5 + $0x98] sm:$0xff]  ;;  %v914_v26 = vpack.c.bf16 %v104_v23, %v102_v22  ;;  %v106_v28 = vld [vmem:[#allocation5 + $0x80] sm:$0xff]  ;;  %v108_v29 = vld [vmem:[#allocation5 + $0x90] sm:$0xff] }
  0x51   :  { %v916_v27 = vpack.c.bf16 %v109_v25, %v107_v24  ;;  %v111_v30 = vld [vmem:[#allocation5 + $0xa8] sm:$0xff]  ;;  %v113_v31 = vld [vmem:[#allocation5 + $0xb8] sm:$0xff]  ;;  %v918_v32 = vpack.c.bf16 %v108_v29, %v106_v28  ;;  %v110_v34 = vld [vmem:[#allocation5 + $0xa0] sm:$0xff]  ;;  %v1326_v18 = vshrl.u32 %v124_v17, 7 }
  0x52   :  { %907 = vmatpush1.bf16.msra.mxu0 %v906_v14  ;;  %v920_v33 = vpack.c.bf16 %v113_v31, %v111_v30  ;;  %v112_v35 = vld [vmem:[#allocation5 + $0xb0] sm:$0xff]  ;;  %v115_v36 = vld [vmem:[#allocation5 + $0xc8] sm:$0xff]  ;;  %v117_v37 = vld [vmem:[#allocation5 + $0xd8] sm:$0xff] }
  0x53   :  { %909 = vmatprep.subr.bf16.mxu0 %v908_v15  ;;  %v922_v38 = vpack.c.bf16 %v112_v35, %v110_v34  ;;  %v924_v39 = vpack.c.bf16 %v117_v37, %v115_v36  ;;  %v114_v40 = vld [vmem:[#allocation5 + $0xc0] sm:$0xff]  ;;  %v116_v41 = vld [vmem:[#allocation5 + $0xd0] sm:$0xff]  ;;  %v119_v42 = vld [vmem:[#allocation5 + $0xe8] sm:$0xff]  ;;  %v126_v19 = vsub.s32 0, %v1326_v18 }
  0x54   :  { %v121_v43 = vld [vmem:[#allocation5 + $0xf8] sm:$0xff]  ;;  %v926_v44 = vpack.c.bf16 %v116_v41, %v114_v40  ;;  %v118_v46 = vld [vmem:[#allocation5 + $0xe0] sm:$0xff]  ;;  %v120_v47 = vld [vmem:[#allocation5 + $0xf0] sm:$0xff] }
  0x55   :  { %v928_v45 = vpack.c.bf16 %v121_v43, %v119_v42  ;;  %v930_v48 = vpack.c.bf16 %v120_v47, %v118_v46  ;;  %v82_v49 = vld [vmem:[#allocation2] sm:$0xff]  ;;  %v83_v50 = vld [vmem:[#allocation2 + $0x8] sm:$0xff]  ;;  %v84_v51 = vld [vmem:[#allocation2 + $0x10] sm:$0xff] }
  0x56   :  { %911 = vmatpush1.bf16.msra.mxu0 %v910_v20  ;;  %v85_v52 = vld [vmem:[#allocation2 + $0x18] sm:$0xff]  ;;  %v86_v53 = vld [vmem:[#allocation2 + $0x20] sm:$0xff]  ;;  %v87_v54 = vld [vmem:[#allocation2 + $0x28] sm:$0xff] }
  0x57   :  { %913 = vmatprep.subr.bf16.mxu0 %v912_v21  ;;  %v88_v55 = vld [vmem:[#allocation2 + $0x30] sm:$0xff]  ;;  %v89_v56 = vld [vmem:[#allocation2 + $0x38] sm:$0xff]  ;;  %v359_v57 = vld [vmem:[#allocation7] sm:$0xff] }
  0x58   :  { %v360_v58 = vld [vmem:[#allocation7 + $0x8] sm:$0xff]  ;;  %v361_v60 = vld [vmem:[#allocation7 + $0x10] sm:$0xff]  ;;  %v362_v61 = vld [vmem:[#allocation7 + $0x18] sm:$0xff] }
  0x59   :  { %v932_v59 = vpack.c.bf16 %v360_v58, %v359_v57  ;;  %v936_v62 = vpack.c.bf16 %v362_v61, %v361_v60  ;;  %v363_v63 = vld [vmem:[#allocation7 + $0x20] sm:$0xff]  ;;  %v364_v1 = vld [vmem:[#allocation7 + $0x28] sm:$0xff]  ;;  %v365_v3 = vld [vmem:[#allocation7 + $0x30] sm:$0xff] }
  0x5a   :  { %915 = vmatpush1.bf16.msra.mxu0 %v914_v26  ;;  %v940_v2 = vpack.c.bf16 %v364_v1, %v363_v63  ;;  %v366_v4 = vld [vmem:[#allocation7 + $0x38] sm:$0xff]  ;;  %v367_v5 = vld [vmem:[#allocation7 + $0x40] sm:$0xff]  ;;  %v368_v6 = vld [vmem:[#allocation7 + $0x48] sm:$0xff] }
  0x5b   :  { %917 = vmatprep.subr.bf16.mxu0 %v916_v27  ;;  %933 = vmatprep.subr.bf16.mxu1 %v932_v59  ;;  %v948_v7 = vpack.c.bf16 %v368_v6, %v367_v5  ;;  %v369_v8 = vld [vmem:[#allocation7 + $0x50] sm:$0xff]  ;;  %v370_v9 = vld [vmem:[#allocation7 + $0x58] sm:$0xff]  ;;  %v371_v11 = vld [vmem:[#allocation7 + $0x60] sm:$0xff] }
  0x5c   :  { %935 = vmatpush3.bf16.msra.mxu1 %v932_v59  ;;  %v952_v10 = vpack.c.bf16 %v370_v9, %v369_v8  ;;  %v372_v12 = vld [vmem:[#allocation7 + $0x68] sm:$0xff]  ;;  %v373_v14 = vld [vmem:[#allocation7 + $0x70] sm:$0xff]  ;;  %v374_v15 = vld [vmem:[#allocation7 + $0x78] sm:$0xff] }
  0x5d   :  { %937 = vmatprep.subr.bf16.mxu1 %v936_v62  ;;  %v956_v13 = vpack.c.bf16 %v372_v12, %v371_v11  ;;  %v960_v16 = vpack.c.bf16 %v374_v15, %v373_v14  ;;  %v1332_v20 = vld [vmem:[%s1476_s2] sm:$0x3] }
  0x5e   :  { %919 = vmatpush1.bf16.msra.mxu0 %v918_v32  ;;  %v127_v21 = vrot.slane %v1332_v20, %v126_v19 }
  0x5f   :  { %921 = vmatprep.subr.bf16.mxu0 %v920_v33 }
  0x60   :  { %939 = vmatpush3.bf16.msra.mxu1 %v936_v62 }
  0x61   :  { %941 = vmatprep.subr.bf16.mxu1 %v940_v2 }
  0x62   :  { %923 = vmatpush1.bf16.msra.mxu0 %v922_v38 }
  0x63   :  { %925 = vmatprep.subr.bf16.mxu0 %v924_v39 }
  0x64   :  { %943 = vmatpush3.bf16.msra.mxu1 %v940_v2 }
  0x66   :  { %927 = vmatpush1.bf16.msra.mxu0 %v926_v44 }
  0x67   :  { %929 = vmatprep.subr.bf16.mxu0 %v928_v45 }
  0x6a   :  { %931 = vmatpush1.bf16.msra.mxu0 %v930_v48 }
  0x6d   :  { %199 = vmatmul.mubr.f32.vlgmr.msra.gmra.mrb[0].mxu0 %v82_v49 }
  0x6e   :  { %204 = vmatprep.mubr.f32.mxu0 %v1212_v0 }
  0x71   :  { %205 = vmatmul.mubr.f32.gmra.mrb[2].mxu0 %v83_v50 }
  0x72   :  { %210 = vmatprep.mubr.f32.mxu0 %v1212_v0 }
  0x75   :  { %211 = vmatmul.mubr.f32.gmra.mrb[4].mxu0 %v84_v51 }
  0x76   :  { %216 = vmatprep.mubr.f32.mxu0 %v1212_v0 }
  0x79   :  { %217 = vmatmul.mubr.f32.gmra.mrb[6].mxu0 %v85_v52 }
  0x7a   :  { %222 = vmatprep.mubr.f32.mxu0 %v1212_v0 }
  0x7d   :  { %223 = vmatmul.mubr.f32.gmra.mrb[8].mxu0 %v86_v53 }
  0x7e   :  { %228 = vmatprep.mubr.f32.mxu0 %v1212_v0 }
  0x81   :  { %229 = vmatmul.mubr.f32.gmra.mrb[10].mxu0 %v87_v54 }
  0x82   :  { %234 = vmatprep.mubr.f32.mxu0 %v1212_v0 }
  0x85   :  { %235 = vmatmul.mubr.f32.gmra.mrb[12].mxu0 %v88_v55 }
  0x86   :  { %240 = vmatprep.mubr.f32.mxu0 %v1212_v0  ;;  %v944_v0 = vpack.c.bf16 %v366_v4, %v365_v3 }
  0x88   :  { %945 = vmatprep.subr.bf16.mxu1 %v944_v0 }
  0x89   :  { %241 = vmatmul.mubr.f32.gmra.mrb[14].mxu0 %v89_v56  ;;  %947 = vmatpush3.bf16.msra.mxu1 %v944_v0 }
  0x8a   :  { %949 = vmatprep.subr.bf16.mxu1 %v948_v7 }
  0x8d   :  { %951 = vmatpush3.bf16.msra.mxu1 %v948_v7 }
  0x8e   :  { %953 = vmatprep.subr.bf16.mxu1 %v952_v10 }
  0x91   :  { %955 = vmatpush3.bf16.msra.mxu1 %v952_v10 }
  0x92   :  { %957 = vmatprep.subr.bf16.mxu1 %v956_v13 }
  0x95   :  { %959 = vmatpush3.bf16.msra.mxu1 %v956_v13 }
  0x96   :  { %961 = vmatprep.subr.bf16.mxu1 %v960_v16 }
  0x99   :  { %963 = vmatpush3.bf16.msra.mxu1 %v960_v16 }
 0x140   :  { %v200_v22 = vpop.f32.mrb[0].mxu0 }
 0x141   :  { %v1335_v23 = vadd.f32 %v200_v22, %v127_v21  ;;  %v1337_v24 = vpop.f32.mrb[1].mxu0 }
 0x143   :  { %v255_v25 = vmin.f32 %v1335_v23, 20.0  ;;  %vm247_vm1 = vcmp.gt.f32.partialorder %v1335_v23, 20.0 }
 0x144   :  { %v206_v26 = vpop.f32.mrb[2].mxu0 }
 0x145   :  { %v263_v27 = vmul.f32 1.442695, %v255_v25  ;;  %v1340_v28 = vadd.f32 %v206_v26, %v127_v21  ;;  %v1342_v29 = vpop.f32.mrb[3].mxu0 }
 0x147   :  { %1022 = vpow2.f32 %v263_v27  ;;  %v256_v30 = vmin.f32 %v1340_v28, 20.0  ;;  %vm248_vm3 = vcmp.gt.f32.partialorder %v1340_v28, 20.0 }
 0x148   :  { %v212_v31 = vpop.f32.mrb[4].mxu0 }
 0x149   :  { %v265_v32 = vmul.f32 1.442695, %v256_v30  ;;  %v1345_v33 = vadd.f32 %v212_v31, %v127_v21  ;;  %v1347_v34 = vpop.f32.mrb[5].mxu0 }
 0x14b   :  { %1024 = vpow2.f32 %v265_v32  ;;  %v257_v35 = vmin.f32 %v1345_v33, 20.0  ;;  %vm249_vm5 = vcmp.gt.f32.partialorder %v1345_v33, 20.0 }
 0x14c   :  { %v218_v36 = vpop.f32.mrb[6].mxu0 }
 0x14d   :  { %v267_v37 = vmul.f32 1.442695, %v257_v35  ;;  %v1350_v38 = vadd.f32 %v218_v36, %v127_v21  ;;  %v1352_v39 = vpop.f32.mrb[7].mxu0 }
 0x14f   :  { %1026 = vpow2.f32 %v267_v37  ;;  %v258_v40 = vmin.f32 %v1350_v38, 20.0  ;;  %vm250_vm7 = vcmp.gt.f32.partialorder %v1350_v38, 20.0 }
 0x150   :  { %v224_v41 = vpop.f32.mrb[8].mxu0 }
 0x151   :  { %v1023_v42 = vpop.eup %1022  ;;  %v269_v43 = vmul.f32 1.442695, %v258_v40  ;;  %v1355_v44 = vadd.f32 %v224_v41, %v127_v21  ;;  %v1357_v45 = vpop.f32.mrb[9].mxu0 }
 0x152   :  { %v279_v46 = vadd.f32 1.0, %v1023_v42  ;;  %v282_v53 = vmul.f32 -0.5, %v1023_v42  ;;  %v285_v3 = vand.u32 2147483647, %v1023_v42 }
 0x153   :  { %1028 = vpow2.f32 %v269_v43  ;;  %v259_v47 = vmin.f32 %v1355_v44, 20.0  ;;  %vm251_vm9 = vcmp.gt.f32.partialorder %v1355_v44, 20.0 }
 0x154   :  { %v230_v48 = vpop.f32.mrb[10].mxu0  ;;  %1030 = vlog2.f32 %v279_v46  ;;  %v283_v61 = vadd.f32 1.0, %v282_v53  ;;  %vm286_vm0 = vcmp.lt.f32.partialorder %v285_v3, 0.0004427343 }
 0x155   :  { %v1025_v49 = vpop.eup %1024  ;;  %v271_v50 = vmul.f32 1.442695, %v259_v47  ;;  %v1360_v51 = vadd.f32 %v230_v48, %v127_v21  ;;  %v1362_v52 = vpop.f32.mrb[11].mxu0 }
 0x156   :  { %v288_v54 = vadd.f32 1.0, %v1025_v49  ;;  %v291_v62 = vmul.f32 -0.5, %v1025_v49  ;;  %v284_v8 = vmul.f32 %v1023_v42, %v283_v61  ;;  %v294_v14 = vand.u32 2147483647, %v1025_v49 }
 0x157   :  { %1032 = vpow2.f32 %v271_v50  ;;  %v260_v55 = vmin.f32 %v1360_v51, 20.0  ;;  %vm252_vm11 = vcmp.gt.f32.partialorder %v1360_v51, 20.0 }
 0x158   :  { %v236_v56 = vpop.f32.mrb[12].mxu0  ;;  %1034 = vlog2.f32 %v288_v54  ;;  %v292_v9 = vadd.f32 1.0, %v291_v62  ;;  %vm295_vm2 = vcmp.lt.f32.partialorder %v294_v14, 0.0004427343 }
 0x159   :  { %v1027_v57 = vpop.eup %1026  ;;  %v273_v58 = vmul.f32 1.442695, %v260_v55  ;;  %v1365_v59 = vadd.f32 %v236_v56, %v127_v21  ;;  %v1367_v60 = vpop.f32.mrb[13].mxu0 }
 0x15a   :  { %v297_v63 = vadd.f32 1.0, %v1027_v57  ;;  %v300_v13 = vmul.f32 -0.5, %v1027_v57  ;;  %v293_v22 = vmul.f32 %v1025_v49, %v292_v9  ;;  %v303_v31 = vand.u32 2147483647, %v1027_v57 }
 0x15b   :  { %1036 = vpow2.f32 %v273_v58  ;;  %v261_v1 = vmin.f32 %v1365_v59, 20.0  ;;  %vm253_vm13 = vcmp.gt.f32.partialorder %v1365_v59, 20.0 }
 0x15c   :  { %v242_v2 = vpop.f32.mrb[14].mxu0  ;;  %1038 = vlog2.f32 %v297_v63  ;;  %v301_v27 = vadd.f32 1.0, %v300_v13  ;;  %vm304_vm4 = vcmp.lt.f32.partialorder %v303_v31, 0.0004427343 }
 0x15d   :  { %v1029_v4 = vpop.eup %1028  ;;  %v275_v0 = vmul.f32 1.442695, %v261_v1  ;;  %v1370_v5 = vadd.f32 %v242_v2, %v127_v21  ;;  %v1372_v6 = vpop.f32.mrb[15].mxu0 }
 0x15e   :  { %v1031_v7 = vpop.eup %1030  ;;  %v306_v10 = vadd.f32 1.0, %v1029_v4  ;;  %v309_v30 = vmul.f32 -0.5, %v1029_v4  ;;  %v302_v41 = vmul.f32 %v1027_v57, %v301_v27  ;;  %v312_v46 = vand.u32 2147483647, %v1029_v4 }
 0x15f   :  { %1040 = vpow2.f32 %v275_v0  ;;  %v262_v11 = vmin.f32 %v1370_v5, 20.0  ;;  %v281_v12 = vmul.f32 0.6931472, %v1031_v7  ;;  %vm254_vm15 = vcmp.gt.f32.partialorder %v1370_v5, 20.0 }
 0x160   :  { %1042 = vlog2.f32 %v306_v10  ;;  %v310_v42 = vadd.f32 1.0, %v309_v30  ;;  %vm313_vm6 = vcmp.lt.f32.partialorder %v312_v46, 0.0004427343 }
 0x161   :  { %v1033_v15 = vpop.eup %1032  ;;  %v277_v16 = vmul.f32 1.442695, %v262_v11  ;;  %v287_v17 = vsel %vm286_vm0, %v284_v8, %v281_v12 }
 0x162   :  { %v1035_v19 = vpop.eup %1034  ;;  %v351_v21 = vsel %vm247_vm1, %v1335_v23, %v287_v17  ;;  %v315_v25 = vadd.f32 1.0, %v1033_v15  ;;  %v318_v43 = vmul.f32 -0.5, %v1033_v15  ;;  %v321_v57 = vand.u32 2147483647, %v1033_v15 }
 0x163   :  { %1044 = vpow2.f32 %v277_v16  ;;  %844 = vmatprep.mubr.f32.mxu1 %v351_v21  ;;  %v290_v26 = vmul.f32 0.6931472, %v1035_v19 }
 0x164   :  { %1046 = vlog2.f32 %v315_v25  ;;  %v319_v55 = vadd.f32 1.0, %v318_v43  ;;  %vm322_vm8 = vcmp.lt.f32.partialorder %v321_v57, 0.0004427343  ;;  %v606_v43 = vld [vmem:[#allocation8 + $0x38] sm:$0xff]  ;;  %v613_v57 = vld [vmem:[#allocation8 + $0x70] sm:$0xff] }
 0x165   :  { %v1037_v32 = vpop.eup %1036  ;;  %v296_v35 = vsel %vm295_vm2, %v293_v22, %v290_v26 }
 0x166   :  { %v1039_v36 = vpop.eup %1038  ;;  %v352_v37 = vsel %vm248_vm3, %v1340_v28, %v296_v35  ;;  %v324_v40 = vadd.f32 1.0, %v1037_v32  ;;  %v311_v28 = vmul.f32 %v1029_v4, %v310_v42  ;;  %v327_v56 = vmul.f32 -0.5, %v1037_v32  ;;  %v600_v35 = vld [vmem:[#allocation8 + $0x8] sm:$0xff] }
 0x167   :  { %845 = vmatmul.mubr.f32.vlgmr.msra.gmra.mrb[0].mxu1 %v352_v37  ;;  %v299_v23 = vmul.f32 0.6931472, %v1039_v36  ;;  %v330_v4 = vand.u32 2147483647, %v1037_v32  ;;  %v601_v37 = vld [vmem:[#allocation8 + $0x10] sm:$0xff] }
 0x168   :  { %1048 = vlog2.f32 %v324_v40  ;;  %v328_v3 = vadd.f32 1.0, %v327_v56  ;;  %v602_v40 = vld [vmem:[#allocation8 + $0x18] sm:$0xff] }
 0x169   :  { %v1041_v47 = vpop.eup %1040  ;;  %v305_v48 = vsel %vm304_vm4, %v302_v41, %v299_v23  ;;  %vm331_vm10 = vcmp.lt.f32.partialorder %v330_v4, 0.0004427343  ;;  %v603_v23 = vld [vmem:[#allocation8 + $0x20] sm:$0xff]  ;;  %v604_v41 = vld [vmem:[#allocation8 + $0x28] sm:$0xff] }
 0x16a   :  { %v1043_v49 = vpop.eup %1042  ;;  %v353_v50 = vsel %vm249_vm5, %v1345_v33, %v305_v48  ;;  %v333_v53 = vadd.f32 1.0, %v1041_v47  ;;  %v320_v33 = vmul.f32 %v1033_v15, %v319_v55  ;;  %v336_v0 = vmul.f32 -0.5, %v1041_v47  ;;  %v608_v48 = vld [vmem:[#allocation8 + $0x48] sm:$0xff] }
 0x16b   :  { %847 = vmatprep.mubr.f32.mxu1 %v353_v50  ;;  %v308_v54 = vmul.f32 0.6931472, %v1043_v49  ;;  %v329_v11 = vmul.f32 %v1037_v32, %v328_v3  ;;  %v339_v13 = vand.u32 2147483647, %v1041_v47  ;;  %v599_v32 = vld [vmem:[#allocation8] sm:$0xff]  ;;  %v972_v42 = vpack.c.bf16 %v604_v41, %v603_v23  ;;  %v609_v50 = vld [vmem:[#allocation8 + $0x50] sm:$0xff] }
 0x16c   :  { %1050 = vlog2.f32 %v333_v53  ;;  %v337_v12 = vadd.f32 1.0, %v336_v0  ;;  %v964_v36 = vpack.c.bf16 %v600_v35, %v599_v32  ;;  %v610_v53 = vld [vmem:[#allocation8 + $0x58] sm:$0xff]  ;;  %v612_v55 = vld [vmem:[#allocation8 + $0x68] sm:$0xff] }
 0x16d   :  { %v1045_v58 = vpop.eup %1044  ;;  %v314_v61 = vsel %vm313_vm6, %v311_v28, %v308_v54  ;;  %vm340_vm12 = vcmp.lt.f32.partialorder %v339_v13, 0.0004427343  ;;  %v984_v54 = vpack.c.bf16 %v610_v53, %v609_v50  ;;  %v611_v28 = vld [vmem:[#allocation8 + $0x60] sm:$0xff] }
 0x16e   :  { %v1047_v62 = vpop.eup %1046  ;;  %v354_v63 = vsel %vm250_vm7, %v1350_v38, %v314_v61  ;;  %v342_v1 = vadd.f32 1.0, %v1045_v58  ;;  %v345_v38 = vmul.f32 -0.5, %v1045_v58  ;;  %v338_v19 = vmul.f32 %v1041_v47, %v337_v12  ;;  %965 = vmatprep.subr.bf16.mxu0 %v964_v36  ;;  %996 = vmatprep.subr.bf16.mxu1 %v964_v36  ;;  %v607_v47 = vld [vmem:[#allocation8 + $0x40] sm:$0xff] }
 0x16f   :  { %848 = vmatmul.mubr.f32.gmra.mrb[2].mxu1 %v354_v63  ;;  %v317_v2 = vmul.f32 0.6931472, %v1047_v62  ;;  %v348_v22 = vand.u32 2147483647, %v1045_v58  ;;  %967 = vmatpush3.bf16.msra.mxu0 %v964_v36  ;;  %v980_v49 = vpack.c.bf16 %v608_v48, %v607_v47  ;;  %v988_v56 = vpack.c.bf16 %v612_v55, %v611_v28  ;;  %v762_v62 = vld [vmem:[%s1478_s4] ss:$0 sm:$0xff] }
 0x170   :  { %1052 = vlog2.f32 %v342_v1  ;;  %v346_v21 = vadd.f32 1.0, %v345_v38  ;;  %1004 = vmatpush3.bf16.msra.mxu1 %v964_v36 }
 0x171   :  { %v323_v7 = vsel %vm322_vm8, %v320_v33, %v317_v2  ;;  %vm349_vm14 = vcmp.lt.f32.partialorder %v348_v22, 0.0004427343 }
 0x172   :  { %v1049_v8 = vpop.eup %1048  ;;  %v355_v9 = vsel %vm251_vm9, %v1355_v44, %v323_v7  ;;  %v347_v30 = vmul.f32 %v1045_v58, %v346_v21  ;;  %v614_v58 = vld [vmem:[#allocation8 + $0x78] sm:$0xff] }
 0x173   :  { %850 = vmatprep.mubr.f32.mxu1 %v355_v9  ;;  %v326_v10 = vmul.f32 0.6931472, %v1049_v8  ;;  %v992_v61 = vpack.c.bf16 %v614_v58, %v613_v57 }
 0x175   :  { %v332_v14 = vsel %vm331_vm10, %v329_v11, %v326_v10 }
 0x176   :  { %v1051_v15 = vpop.eup %1050  ;;  %v356_v16 = vsel %vm252_vm11, %v1360_v51, %v332_v14 }
 0x177   :  { %851 = vmatmul.mubr.f32.gmra.mrb[4].mxu1 %v356_v16  ;;  %v335_v17 = vmul.f32 0.6931472, %v1051_v15 }
 0x179   :  { %v341_v44 = vsel %vm340_vm12, %v338_v19, %v335_v17 }
 0x17a   :  { %v1053_v25 = vpop.eup %1052  ;;  %v357_v26 = vsel %vm253_vm13, %v1365_v59, %v341_v44  ;;  %v968_v59 = vpack.c.bf16 %v602_v40, %v601_v37 }
 0x17b   :  { %853 = vmatprep.mubr.f32.mxu1 %v357_v26  ;;  %v344_v27 = vmul.f32 0.6931472, %v1053_v25 }
 0x17c   :  { %969 = vmatprep.subr.bf16.mxu0 %v968_v59  ;;  %997 = vmatprep.subr.bf16.mxu1 %v968_v59 }
 0x17d   :  { %v350_v31 = vsel %vm349_vm14, %v347_v30, %v344_v27  ;;  %971 = vmatpush3.bf16.msra.mxu0 %v968_v59  ;;  %1005 = vmatpush3.bf16.msra.mxu1 %v968_v59 }
 0x17e   :  { %v358_v51 = vsel %vm254_vm15, %v1370_v5, %v350_v31  ;;  %973 = vmatprep.subr.bf16.mxu0 %v972_v42  ;;  %998 = vmatprep.subr.bf16.mxu1 %v972_v42  ;;  %v605_v5 = vld [vmem:[#allocation8 + $0x30] sm:$0xff] }
 0x17f   :  { %854 = vmatmul.mubr.f32.gmra.mrb[6].mxu1 %v358_v51  ;;  %v976_v46 = vpack.c.bf16 %v606_v43, %v605_v5 }
 0x181   :  { %975 = vmatpush3.bf16.msra.mxu0 %v972_v42  ;;  %1006 = vmatpush3.bf16.msra.mxu1 %v972_v42 }
 0x182   :  { %977 = vmatprep.subr.bf16.mxu0 %v976_v46  ;;  %999 = vmatprep.subr.bf16.mxu1 %v976_v46 }
 0x185   :  { %979 = vmatpush3.bf16.msra.mxu0 %v976_v46  ;;  %1007 = vmatpush3.bf16.msra.mxu1 %v976_v46 }
 0x186   :  { %981 = vmatprep.subr.bf16.mxu0 %v980_v49  ;;  %1000 = vmatprep.subr.bf16.mxu1 %v980_v49 }
 0x189   :  { %983 = vmatpush3.bf16.msra.mxu0 %v980_v49  ;;  %1008 = vmatpush3.bf16.msra.mxu1 %v980_v49 }
 0x18a   :  { %985 = vmatprep.subr.bf16.mxu0 %v984_v54  ;;  %1001 = vmatprep.subr.bf16.mxu1 %v984_v54 }
 0x18d   :  { %987 = vmatpush3.bf16.msra.mxu0 %v984_v54  ;;  %1009 = vmatpush3.bf16.msra.mxu1 %v984_v54 }
 0x18e   :  { %989 = vmatprep.subr.bf16.mxu0 %v988_v56  ;;  %1002 = vmatprep.subr.bf16.mxu1 %v988_v56 }
 0x191   :  { %991 = vmatpush3.bf16.msra.mxu0 %v988_v56  ;;  %1010 = vmatpush3.bf16.msra.mxu1 %v988_v56 }
 0x192   :  { %993 = vmatprep.subr.bf16.mxu0 %v992_v61  ;;  %1003 = vmatprep.subr.bf16.mxu1 %v992_v61 }
 0x195   :  { %995 = vmatpush3.bf16.msra.mxu0 %v992_v61  ;;  %1011 = vmatpush3.bf16.msra.mxu1 %v992_v61 }
 0x23a   :  { %v846_v63 = vpop.f32.mrb[0].mxu1 }
 0x23b   :  { %v1394_v1 = vadd.f32 %v846_v63, %v762_v62  ;;  %v448_v2 = vpop.f32.mrb[1].mxu1 }
 0x23c   :  { %v1396_v33 = vadd.f32 %v762_v62, %v448_v2 }
 0x23d   :  { %v496_v3 = vmin.f32 %v1394_v1, 20.0  ;;  %vm488_vm1 = vcmp.gt.f32.partialorder %v1394_v1, 20.0 }
 0x23e   :  { %v495_v0 = vmin.f32 %v1396_v33, 20.0  ;;  %vm487_vm3 = vcmp.gt.f32.partialorder %v1396_v33, 20.0 }
 0x23f   :  { %v505_v4 = vmul.f32 1.442695, %v496_v3 }
 0x240   :  { %v503_v7 = vmul.f32 1.442695, %v495_v0 }
 0x241   :  { %1054 = vpow2.f32 %v505_v4 }
 0x242   :  { %1056 = vpow2.f32 %v503_v7  ;;  %v849_v8 = vpop.f32.mrb[2].mxu1 }
 0x243   :  { %v1400_v9 = vadd.f32 %v849_v8, %v762_v62  ;;  %v458_v10 = vpop.f32.mrb[3].mxu1 }
 0x244   :  { %v1402_v11 = vadd.f32 %v762_v62, %v458_v10 }
 0x245   :  { %v498_v12 = vmin.f32 %v1400_v9, 20.0  ;;  %vm490_vm7 = vcmp.gt.f32.partialorder %v1400_v9, 20.0 }
 0x246   :  { %v497_v38 = vmin.f32 %v1402_v11, 20.0  ;;  %vm489_vm6 = vcmp.gt.f32.partialorder %v1402_v11, 20.0 }
 0x247   :  { %v509_v13 = vmul.f32 1.442695, %v498_v12 }
 0x248   :  { %v507_v14 = vmul.f32 1.442695, %v497_v38 }
 0x249   :  { %1058 = vpow2.f32 %v509_v13 }
 0x24a   :  { %1060 = vpow2.f32 %v507_v14  ;;  %v852_v15 = vpop.f32.mrb[4].mxu1 }
 0x24b   :  { %v1055_v16 = vpop.eup %1054  ;;  %v1406_v17 = vadd.f32 %v852_v15, %v762_v62  ;;  %v468_v19 = vpop.f32.mrb[5].mxu1 }
 0x24c   :  { %v1057_v21 = vpop.eup %1056  ;;  %v528_v22 = vadd.f32 1.0, %v1055_v16  ;;  %v1408_v44 = vadd.f32 %v762_v62, %v468_v19  ;;  %v531_v51 = vmul.f32 -0.5, %v1055_v16  ;;  %v534_v47 = vand.u32 2147483647, %v1055_v16 }
 0x24d   :  { %v500_v25 = vmin.f32 %v1406_v17, 20.0  ;;  %v519_v26 = vadd.f32 1.0, %v1057_v21  ;;  %v522_v40 = vmul.f32 -0.5, %v1057_v21  ;;  %v525_v54 = vand.u32 2147483647, %v1057_v21 }
 0x24e   :  { %1062 = vlog2.f32 %v528_v22  ;;  %v499_v27 = vmin.f32 %v1408_v44, 20.0  ;;  %v532_v43 = vadd.f32 1.0, %v531_v51  ;;  %vm1418_vm0 = vcmp.lt.f32.partialorder %v534_v47, 0.0004427343 }
 0x24f   :  { %v513_v30 = vmul.f32 1.442695, %v500_v25  ;;  %1064 = vlog2.f32 %v519_v26  ;;  %v523_v49 = vadd.f32 1.0, %v522_v40  ;;  %vm526_vm2 = vcmp.lt.f32.partialorder %v525_v54, 0.0004427343 }
 0x250   :  { %v511_v31 = vmul.f32 1.442695, %v499_v27  ;;  %v533_v57 = vmul.f32 %v1055_v16, %v532_v43  ;;  %vm491_vm10 = vcmp.gt.f32.partialorder %v1408_v44, 20.0  ;;  %vm492_vm11 = vcmp.gt.f32.partialorder %v1406_v17, 20.0 }
 0x251   :  { %1066 = vpow2.f32 %v513_v30  ;;  %v524_v2 = vmul.f32 %v1057_v21, %v523_v49 }
 0x252   :  { %1068 = vpow2.f32 %v511_v31  ;;  %v855_v32 = vpop.f32.mrb[6].mxu1 }
 0x253   :  { %v1059_v35 = vpop.eup %1058  ;;  %v1412_v36 = vadd.f32 %v855_v32, %v762_v62  ;;  %v478_v37 = vpop.f32.mrb[7].mxu1 }
 0x254   :  { %v1061_v59 = vpop.eup %1060  ;;  %v1414_v23 = vadd.f32 %v762_v62, %v478_v37  ;;  %v546_v41 = vadd.f32 1.0, %v1059_v35  ;;  %v549_v56 = vmul.f32 -0.5, %v1059_v35  ;;  %v552_v13 = vand.u32 2147483647, %v1059_v35 }
 0x255   :  { %v502_v42 = vmin.f32 %v1412_v36, 20.0  ;;  %v537_v5 = vadd.f32 1.0, %v1061_v59  ;;  %v540_v61 = vmul.f32 -0.5, %v1061_v59  ;;  %v543_v15 = vand.u32 2147483647, %v1061_v59 }
 0x256   :  { %v501_v46 = vmin.f32 %v1414_v23, 20.0  ;;  %1070 = vlog2.f32 %v546_v41  ;;  %v550_v8 = vadd.f32 1.0, %v549_v56  ;;  %vm1428_vm4 = vcmp.lt.f32.partialorder %v552_v13, 0.0004427343  ;;  %v763_v13 = vld [vmem:[%s1480_s6] ss:$0 sm:$0xff] }
 0x257   :  { %v517_v48 = vmul.f32 1.442695, %v502_v42  ;;  %1072 = vlog2.f32 %v537_v5  ;;  %v541_v38 = vadd.f32 1.0, %v540_v61  ;;  %vm544_vm5 = vcmp.lt.f32.partialorder %v543_v15, 0.0004427343  ;;  %s1213_s6 = smov [#allocation10]  }
 0x258   :  { %v1063_v50 = vpop.eup %1062  ;;  %v515_v53 = vmul.f32 1.442695, %v501_v46  ;;  %v551_v25 = vmul.f32 %v1059_v35, %v550_v8  ;;  %vm493_vm14 = vcmp.gt.f32.partialorder %v1414_v23, 20.0  ;;  %vm494_vm15 = vcmp.gt.f32.partialorder %v1412_v36, 20.0  ;;  %s748_s8 = sshll.u32 %s1213_s6, 4  ;;  %s749_s8 = int_to_ptr.vmem [resolvable:$true] %s748_s8 }
 0x259   :  { %v1065_v28 = vpop.eup %1064  ;;  %v530_v55 = vmul.f32 0.6931472, %v1063_v50  ;;  %1074 = vpow2.f32 %v517_v48  ;;  %v542_v27 = vmul.f32 %v1061_v59, %v541_v38  ;;  %s1174_s9 = scalar_lea.vmem %s749_s8, 1024  ;;  %p1179_p5 = scmp.lt.s32.totalorder %s749_s8, %s749_s8 }
 0x25a   :  { %1076 = vpow2.f32 %v515_v53  ;;  %v521_v58 = vmul.f32 0.6931472, %v1065_v28  ;;  %p1175_p4 = scmp.ne.s32.totalorder %s749_s8, %s1174_s9  ;;  %p1180_p6 = scmp.lt.s32.totalorder %s1174_s9, %s1174_s9 }
 0x25b   :  { %v1067_v62 = vpop.eup %1066  ;;  %v536_v0 = vsel %vm1418_vm0, %v533_v57, %v530_v55 }
 0x25c   :  { %v1069_v3 = vpop.eup %1068  ;;  %v564_v4 = vadd.f32 1.0, %v1067_v62  ;;  %v527_v7 = vsel %vm526_vm2, %v524_v2, %v521_v58  ;;  %v592_v14 = vsel %vm488_vm1, %v1394_v1, %v536_v0  ;;  %v567_v21 = vmul.f32 -0.5, %v1067_v62  ;;  %p1181_p7 = por %p1180_p6, %p1179_p5 }
 0x25d   :  { %v555_v10 = vadd.f32 1.0, %v1069_v3  ;;  %v591_v12 = vsel %vm487_vm3, %v1396_v33, %v527_v7  ;;  %v558_v33 = vmul.f32 -0.5, %v1069_v3  ;;  %v570_v41 = vand.u32 2147483647, %v1067_v62 }
 0x25e   :  { %1078 = vlog2.f32 %v564_v4  ;;  %888 = vmatprep.mubr.f32.mxu0 %v591_v12  ;;  %v568_v40 = vadd.f32 1.0, %v567_v21  ;;  %v561_v43 = vand.u32 2147483647, %v1069_v3  ;;  %v130_v12 = vsub.s32 1, %v1326_v18  ;;  %p1182_p8 = pnand %p1181_p7, %p1175_p4 }
 0x25f   :  { %1080 = vlog2.f32 %v555_v10  ;;  %889 = vmatmul.mubr.f32.vlgmr.msra.gmra.mrb[16].mxu0 %v592_v14  ;;  %v559_v5 = vadd.f32 1.0, %v558_v33  ;;  %vm571_vm8 = vcmp.lt.f32.partialorder %v570_v41, 0.0004427343 }
 0x260   :  { %v1071_v16 = vpop.eup %1070  ;;  %v569_v49 = vmul.f32 %v1067_v62, %v568_v40  ;;  %vm562_vm9 = vcmp.lt.f32.partialorder %v561_v43, 0.0004427343  ;;  %v131_v38 = vrot.slane %v1332_v20, %v130_v12 }
 0x261   :  { %v1073_v19 = vpop.eup %1072  ;;  %v548_v22 = vmul.f32 0.6931472, %v1071_v16 }
 0x262   :  { %v539_v26 = vmul.f32 0.6931472, %v1073_v19  ;;  %v209_v15 = vadd.f32 %v1342_v29, %v131_v38  ;;  %v221_v18 = vadd.f32 %v1352_v39, %v131_v38 }
 0x263   :  { %v1075_v31 = vpop.eup %1074  ;;  %v554_v1 = vsel %vm1428_vm4, %v551_v25, %v548_v22 }
 0x264   :  { %v1077_v51 = vpop.eup %1076  ;;  %v545_v32 = vsel %vm544_vm5, %v542_v27, %v539_v26  ;;  %v582_v37 = vadd.f32 1.0, %v1075_v31  ;;  %v594_v42 = vsel %vm490_vm7, %v1400_v9, %v554_v1  ;;  %v585_v50 = vmul.f32 -0.5, %v1075_v31 }
 0x265   :  { %v593_v35 = vsel %vm489_vm6, %v1402_v11, %v545_v32  ;;  %v573_v59 = vadd.f32 1.0, %v1077_v51  ;;  %v560_v11 = vmul.f32 %v1069_v3, %v559_v5  ;;  %v576_v54 = vmul.f32 -0.5, %v1077_v51 }
 0x266   :  { %891 = vmatprep.mubr.f32.mxu0 %v593_v35  ;;  %1082 = vlog2.f32 %v582_v37  ;;  %v586_v56 = vadd.f32 1.0, %v585_v50  ;;  %v588_v61 = vand.u32 2147483647, %v1075_v31  ;;  %v579_v62 = vand.u32 2147483647, %v1077_v51 }
 0x267   :  { %892 = vmatmul.mubr.f32.gmra.mrb[18].mxu0 %v594_v42  ;;  %1084 = vlog2.f32 %v573_v59  ;;  %v577_v58 = vadd.f32 1.0, %v576_v54  ;;  %v215_v27 = vadd.f32 %v1347_v34, %v131_v38  ;;  %v227_v32 = vadd.f32 %v1357_v45, %v131_v38 }
 0x268   :  { %v1079_v46 = vpop.eup %1078  ;;  %v587_v0 = vmul.f32 %v1075_v31, %v586_v56  ;;  %vm589_vm12 = vcmp.lt.f32.partialorder %v588_v61, 0.0004427343  ;;  %vm580_vm13 = vcmp.lt.f32.partialorder %v579_v62, 0.0004427343  ;;  %v245_v34 = vadd.f32 %v1372_v6, %v131_v38 }
 0x269   :  { %v1081_v47 = vpop.eup %1080  ;;  %v566_v48 = vmul.f32 0.6931472, %v1079_v46  ;;  %v578_v7 = vmul.f32 %v1077_v51, %v577_v58  ;;  %v239_v42 = vadd.f32 %v1367_v60, %v131_v38 }
 0x26a   :  { %v557_v53 = vmul.f32 0.6931472, %v1081_v47 }
 0x26b   :  { %v572_v28 = vsel %vm571_vm8, %v569_v49, %v566_v48 }
 0x26c   :  { %v563_v55 = vsel %vm562_vm9, %v560_v11, %v557_v53  ;;  %v596_v57 = vsel %vm492_vm11, %v1406_v17, %v572_v28 }
 0x26d   :  { %v595_v9 = vsel %vm491_vm10, %v1408_v44, %v563_v55 }
 0x26e   :  { %894 = vmatprep.mubr.f32.mxu1 %v595_v9 }
 0x26f   :  { %895 = vmatmul.mubr.f32.vlgmr.msra.gmra.mrb[8].mxu1 %v596_v57 }
 0x270   :  { %v1083_v63 = vpop.eup %1082 }
 0x271   :  { %v1085_v2 = vpop.eup %1084  ;;  %v584_v3 = vmul.f32 0.6931472, %v1083_v63 }
 0x272   :  { %v575_v4 = vmul.f32 0.6931472, %v1085_v2 }
 0x273   :  { %v590_v8 = vsel %vm589_vm12, %v587_v0, %v584_v3 }
 0x274   :  { %v581_v44 = vsel %vm580_vm13, %v578_v7, %v575_v4  ;;  %v598_v17 = vsel %vm494_vm15, %v1412_v36, %v590_v8 }
 0x275   :  { %v597_v10 = vsel %vm493_vm14, %v1414_v23, %v581_v44  ;;  %v203_v23 = vadd.f32 %v1337_v24, %v131_v38  ;;  %v233_v24 = vadd.f32 %v1362_v52, %v131_v38 }
 0x276   :  { %897 = vmatprep.mubr.f32.mxu1 %v597_v10 }
 0x277   :  { %898 = vmatmul.mubr.f32.gmra.mrb[10].mxu1 %v598_v17 }
 0x332   :  { %v890_v14 = vpop.f32.mrb[16].mxu0 }
 0x333   :  { %v694_v16 = vadd.f32 %v890_v14, %v763_v13  ;;  %v688_v19 = vpop.f32.mrb[17].mxu0 }
 0x334   :  { %v689_v21 = vadd.f32 %v763_v13, %v688_v19 }
 0x335   :  { %v728_v22 = vadd.f32 %v694_v16, %v209_v15 }
 0x336   :  { %v727_v25 = vadd.f32 %v689_v21, %v203_v23 }
 0x337   :  { %736 = vst [vmem:[#allocation10 + $0x8] sm:$0xff] %v728_v22 }
 0x338   :  { %735 = vst [vmem:[#allocation10] sm:$0xff] %v727_v25 }
 0x33a   :  { %v893_v36 = vpop.f32.mrb[18].mxu0 }
 0x33b   :  { %v704_v20 = vadd.f32 %v893_v36, %v763_v13  ;;  %v698_v26 = vpop.f32.mrb[19].mxu0 }
 0x33c   :  { %v699_v30 = vadd.f32 %v763_v13, %v698_v26 }
 0x33d   :  { %v730_v33 = vadd.f32 %v704_v20, %v221_v18 }
 0x33e   :  { %v729_v31 = vadd.f32 %v699_v30, %v215_v27 }
 0x33f   :  { %738 = vst [vmem:[#allocation10 + $0x18] sm:$0xff] %v730_v33 }
 0x340   :  { %737 = vst [vmem:[#allocation10 + $0x10] sm:$0xff] %v729_v31 }
 0x342   :  { %v896_v29 = vpop.f32.mrb[8].mxu1 }
 0x343   :  { %v714_v1 = vadd.f32 %v896_v29, %v763_v13  ;;  %v708_v51 = vpop.f32.mrb[9].mxu1 }
 0x344   :  { %v709_v37 = vadd.f32 %v763_v13, %v708_v51 }
 0x345   :  { %v732_v40 = vadd.f32 %v714_v1, %v233_v24 }
 0x346   :  { %v731_v35 = vadd.f32 %v709_v37, %v227_v32 }
 0x347   :  { %740 = vst [vmem:[#allocation10 + $0x28] sm:$0xff] %v732_v40 }
 0x348   :  { %739 = vst [vmem:[#allocation10 + $0x20] sm:$0xff] %v731_v35 }
 0x34a   :  { %v899_v39 = vpop.f32.mrb[10].mxu1 }
 0x34b   :  { %v724_v59 = vadd.f32 %v899_v39, %v763_v13  ;;  %v718_v41 = vpop.f32.mrb[11].mxu1 }
 0x34c   :  { %v719_v5 = vadd.f32 %v763_v13, %v718_v41 }
 0x34d   :  { %v734_v52 = vadd.f32 %v724_v59, %v245_v34 }
 0x34e   :  { %v733_v43 = vadd.f32 %v719_v5, %v239_v42 }
 0x34f   :  { %742 = vst [vmem:[#allocation10 + $0x38] sm:$0xff] %v734_v52 }
 0x350   :  { %741 = vst [vmem:[#allocation10 + $0x30] sm:$0xff] %v733_v43 }
 0x351   :  { %1185 = shalt.err (!%p1182_p8)
}
 0x352   :  { %s1186_s12 = scalar_lea.hbm %s1481_s7, 1024 }
 0x353   :  { %p1187_p9 = scmp.ne.s32.totalorder %s1481_s7, %s1186_s12  ;;  %p1190_p10 = scmp.lt.u32.totalorder %s1186_s12, %s1481_s7 }
 0x355   :  { %p1192_p11 = pnand %p1190_p10, %p1187_p9 }
 0x357   :  { %1195 = shalt.err (!%p1192_p11)
}
 0x358   :  { %754 = dma.vmem_to_hbm [thread:$0]  %s749_s8, 1024, %s1481_s7, [#allocation4], %s1208_s1, %s1208_s1, %s1209_s25  }
 0x359   :  { %1202 = dma.done.wait [#allocation4], 1024  }
 0x35a   :  { %1203 = vsyncadd [#allocation4], 4294966272 }
 0x35b   :  { %758 = vsyncpa [#allocation3], 1 }
 0x35c   :  { %759 = vsyncpa [#allocation6], 1 }
 0x35d   :  { %760 = vsyncpa [#allocation9], 1 }
 0x35e   :  { %761 = vsyncpa [#allocation4], 1 }

</bundles_post_ra>
